<compile_context>
chip_gen: v7x
topology: tpu7x:2x2x1
jax: 0.10.0
libtpu: 0.0.40
codegen_flags: <defaults>
</compile_context>

<pallas_src>
import functools

import jax
import jax.numpy as jnp
import numpy as np
from jax import lax
from jax.experimental import pallas as pl
from jax.experimental.pallas import tpu as pltpu


# ----------------------- fused QLSTM chunk kernel ------------------------- #
def qlstm_fused_kernel(x_ref, wx_ref, bx_ref, u_ref, wo_ref, bo_ref, out_ref,
                       gx_scr, hseq_scr, h_state, c_state,
                       *, hidden_dim, ts, batch):
    H = hidden_dim
    B = batch

    # Initialize the carried recurrent state at the first time chunk.
    @pl.when(pl.program_id(0) == 0)
    def _():
        h_state[...] = jnp.zeros_like(h_state)
        c_state[...] = jnp.zeros_like(c_state)

    # ---- Chunk prologue (off the serial path): input projection ----------
    # gx = x_chunk @ Wx + bx for all `ts` steps at once; bf16 operands with
    # f32 accumulation.  x_ref is already 2-D: (ts*B, F).
    x2d = x_ref[...].astype(jnp.bfloat16)
    gx_scr[...] = (jnp.dot(x2d, wx_ref[...],
                           preferred_element_type=jnp.float32)
                   + bx_ref[...])                       # (ts*B, 4H) f32

    # ---- Serial recurrence: only h @ U sits on the per-step chain --------
    def step(t, carry):
        h, c = carry
        base = t * B
        if not isinstance(t, int):                      # dynamic (fori) path
            base = pl.multiple_of(base, B)
        # TODO(synk): hold U weight-stationary explicitly across the chunk
        # via pltpu.matmul_push_rhs / matmul_acc_lhs / matmul_pop (and on v7x
        # fold the gx[t] add into the MRB accumulate); for now we rely on the
        # constant-index VMEM-resident U and Mosaic's scheduling.
        gh = jnp.dot(h.astype(u_ref.dtype), u_ref[...],
                     preferred_element_type=jnp.float32)
        z = gx_scr[pl.ds(base, B), :] + gh              # (B, 4H) f32
        gates = jax.nn.sigmoid(z[:, :3 * H])            # one EUP push: f,i,o
        ft = gates[:, 0 * H:1 * H]
        it = gates[:, 1 * H:2 * H]
        ot = gates[:, 2 * H:3 * H]
        at = jnp.tanh(z[:, 3 * H:4 * H])
        c = it * at + ft * c                            # f32 VPU (v5e-safe)
        h = ot * jnp.tanh(c)
        hseq_scr[pl.ds(base, B), :] = h                 # lane-dense (B,H)
        return (h, c)

    carry = (h_state[...], c_state[...])
    if ts <= 16:
        # Small chunk: full static unroll; h/c stay in vregs across steps.
        for t in range(ts):
            carry = step(t, carry)
    else:
        # Large chunk: partially-unrolled fori_loop keeps scheduler
        # visibility while capping vreg pressure / code size.
        carry = lax.fori_loop(0, ts, step, carry, unroll=8)
    h, c = carry
    h_state[...] = h
    c_state[...] = c

    # ---- Chunk epilogue (off the serial path): classifier -----------------
    # (ts*B, H) @ (H, C_pad), lane-dense padded output columns.
    h2d = hseq_scr[...].astype(jnp.bfloat16)
    out = (jnp.dot(h2d, wo_ref[...], preferred_element_type=jnp.float32)
           + bo_ref[...])
    out_ref[...] = out.astype(out_ref.dtype)


# ------------------------------ full forward ------------------------------- #
def qlstm_forward(x, wx, bx, u, wfco, bfco, *, hidden_dim, ts=None,
                  recurrent_dtype=jnp.bfloat16):
    T, B, F = x.shape
    H = hidden_dim
    C = wfco.shape[1]
    assert wx.shape == (F, 4 * H) and u.shape == (H, 4 * H)

    if ts is None:
        # Amortize the ~0.35us per-grid-step overhead; per-chunk scratch
        # (ts*B*4H f32 + ts*B*H f32) stays far under the scoped VMEM budget.
        ts = min(T, 64)
    assert T % ts == 0, "seq length must be divisible by the time-chunk size"
    num_chunks = T // ts

    # Pad batch to a multiple of 16: the bf16 LHS sublane tile is (16,128),
    # extra rows are free on the MXU, and it removes per-step pack/mask work
    # from the serial chain.  Padded rows are sliced away at the end.
    B_pad = max(16, ((B + 15) // 16) * 16)
    if B_pad != B:
        x = jnp.pad(x, ((0, 0), (0, B_pad - B), (0, 0)))

    # Pad the classifier output dim up to a lane-dense multiple of 128
    # (unmasked stores); sliced back to C in the wrapper.
    C_pad = ((C + 127) // 128) * 128
    wo = jnp.pad(wfco, ((0, 0), (0, C_pad - C))).astype(jnp.bfloat16)
    bo = jnp.pad(bfco, ((0, 0), (0, C_pad - C)))

    x2d = x.reshape(T * B_pad, F)              # free XLA-side reshape
    wx_b = wx.astype(jnp.bfloat16)
    # TODO(synk): bf16 U compounds rounding through long recurrences; pass
    # recurrent_dtype=jnp.float32 as a fallback for very long sequences.
    u_b = u.astype(recurrent_dtype)

    kernel = functools.partial(qlstm_fused_kernel, hidden_dim=H, ts=ts,
                               batch=B_pad)

    out2d = pl.pallas_call(
        kernel,
        out_shape=jax.ShapeDtypeStruct((T * B_pad, C_pad), jnp.float32),
        grid_spec=pltpu.PrefetchScalarGridSpec(
            num_scalar_prefetch=0,
            grid=(num_chunks,),
            in_specs=[
                pl.BlockSpec((ts * B_pad, F), lambda s: (s, 0)),   # x chunk
                pl.BlockSpec((F, 4 * H), lambda s: (0, 0)),        # Wx (bf16)
                pl.BlockSpec((1, 4 * H), lambda s: (0, 0)),        # bx
                pl.BlockSpec((H, 4 * H), lambda s: (0, 0)),        # U  (bf16)
                pl.BlockSpec((H, C_pad), lambda s: (0, 0)),        # Wfco
                pl.BlockSpec((1, C_pad), lambda s: (0, 0)),        # bfco
            ],
            out_specs=pl.BlockSpec((ts * B_pad, C_pad), lambda s: (s, 0)),
            scratch_shapes=[
                pltpu.VMEM((ts * B_pad, 4 * H), jnp.float32),  # gx chunk
                pltpu.VMEM((ts * B_pad, H), jnp.float32),      # h sequence
                pltpu.VMEM((B_pad, H), jnp.float32),           # carried h
                pltpu.VMEM((B_pad, H), jnp.float32),           # carried c
            ],
        ),
        compiler_params=pltpu.CompilerParams(
            # Time is inherently serial.
            # TODO(synk): for large B on v7x add a leading 'parallel' batch
            # grid axis so the independent batch splits across the 2 TCs.
            dimension_semantics=("arbitrary",),
        ),
    )(x2d, wx_b, bx, u_b, wo, bo)

    out = out2d.reshape(T, B_pad, C_pad)
    return out[:, :B, :C]


# --------------------------- parameter building --------------------------- #
def quaternion_cat_kernel(r, i, j, k):
    """Real (in, out) matrix equivalent to the Hamilton product, exactly as
    quaternion_linear() builds it in the PyTorch reference."""
    cat_r = jnp.concatenate([r, -i, -j, -k], axis=0)
    cat_i = jnp.concatenate([i, r, -k, j], axis=0)
    cat_j = jnp.concatenate([j, k, r, -i], axis=0)
    cat_k = jnp.concatenate([k, -j, i, r], axis=0)
    return jnp.concatenate([cat_r, cat_i, cat_j, cat_k], axis=1)


def make_quaternion_linear(key, in_features, out_features):
    """Deterministic stand-in for quaternion_init (glorot-scaled random)."""
    in_q, out_q = in_features // 4, out_features // 4
    s = 1.0 / np.sqrt(2.0 * (in_q + out_q))
    ks = jax.random.split(key, 4)
    r = s * jax.random.normal(ks[0], (in_q, out_q), jnp.float32)
    i = s * jax.random.normal(ks[1], (in_q, out_q), jnp.float32)
    j = s * jax.random.normal(ks[2], (in_q, out_q), jnp.float32)
    k = s * jax.random.normal(ks[3], (in_q, out_q), jnp.float32)
    return quaternion_cat_kernel(r, i, j, k)  # (in_features, out_features)


# ------------------------------ JAX reference ------------------------------ #
def qlstm_reference(x, wx, bx, u, wfco, bfco, hidden_dim):
    T, B, F = x.shape
    H = hidden_dim
    h = jnp.zeros((B, H), jnp.float32)
    c = jnp.zeros((B, H), jnp.float32)
    gx_all = jnp.einsum("tbf,fg->tbg", x, wx,
                        precision=jax.lax.Precision.HIGHEST) + bx
    outs = []
    for t in range(T):
        z = gx_all[t] + jnp.dot(h, u, precision=jax.lax.Precision.HIGHEST)
        ft = jax.nn.sigmoid(z[:, 0 * H:1 * H])
        it = jax.nn.sigmoid(z[:, 1 * H:2 * H])
        ot = jax.nn.sigmoid(z[:, 2 * H:3 * H])
        at = z[:, 3 * H:4 * H]
        c = it * jnp.tanh(at) + ft * c
        h = ot * jnp.tanh(c)
        outs.append(jnp.dot(h, wfco, precision=jax.lax.Precision.HIGHEST) + bfco)
    return jnp.stack(outs, axis=0)


# ---------------------------------- main ----------------------------------- #
if __name__ == "__main__":
    # Small shapes consistent with QLSTM's forward: x is (T, B, feat_size).
    T, B = 16, 8
    feat_size = 32          # divisible by 4 (quaternion)
    hidden_size = 128       # divisible by 4 (quaternion), lane-dense
    num_classes = feat_size + 1

    key = jax.random.PRNGKey(0)
    keys = jax.random.split(key, 12)

    x = jax.random.normal(keys[0], (T, B, feat_size), jnp.float32)

    # Input-side quaternion linears (bias filled with 0 as in reset_parameters).
    Wfx = make_quaternion_linear(keys[1], feat_size, hidden_size)
    Wix = make_quaternion_linear(keys[2], feat_size, hidden_size)
    Wox = make_quaternion_linear(keys[3], feat_size, hidden_size)
    Wcx = make_quaternion_linear(keys[4], feat_size, hidden_size)
    bx = jnp.zeros((1, 4 * hidden_size), jnp.float32)

    # Recurrent quaternion linears (no bias).
    Ufh = make_quaternion_linear(keys[5], hidden_size, hidden_size)
    Uih = make_quaternion_linear(keys[6], hidden_size, hidden_size)
    Uoh = make_quaternion_linear(keys[7], hidden_size, hidden_size)
    Uch = make_quaternion_linear(keys[8], hidden_size, hidden_size)

    # Fuse the four gates along the output dimension: order [f, i, o, c].
    Wx = jnp.concatenate([Wfx, Wix, Wox, Wcx], axis=1)   # (F, 4H)
    U = jnp.concatenate([Ufh, Uih, Uoh, Uch], axis=1)    # (H, 4H)

    # Final nn.Linear(hidden, num_classes), stored as (H, C) so out = h @ W + b.
    lim = 1.0 / np.sqrt(hidden_size)
    Wfco = jax.random.uniform(keys[9], (hidden_size, num_classes),
                              jnp.float32, -lim, lim)
    bfco = jax.random.uniform(keys[10], (1, num_classes), jnp.float32, -lim, lim)

    # ts=8 with T=16 -> grid of 2 time chunks, exercising the carried-state
    # path across chunk boundaries.
    fwd = jax.jit(functools.partial(qlstm_forward, hidden_dim=hidden_size, ts=8))
    out = fwd(x, Wx, bx, U, Wfco, bfco)
    out = jax.block_until_ready(out)

    ref = qlstm_reference(x, Wx, bx, U, Wfco, bfco, hidden_size)
    # bf16 matmul operands (f32 accumulation) vs f32 HIGHEST reference.
    np.testing.assert_allclose(np.asarray(out), np.asarray(ref),
                               rtol=3e-2, atol=3e-2)

    assert out.shape == (T, B, num_classes)
    print("KERNEL_OK")
</pallas_src>

<mosaic_0001>
module attributes {stable_mosaic.version = 11 : i64} {
  func.func @qlstm_fused_kernel(%arg0: i32, %arg1: memref<128x32xf32, #tpu.memory_space<vmem>>, %arg2: memref<32x512xbf16, #tpu.memory_space<vmem>>, %arg3: memref<1x512xf32, #tpu.memory_space<vmem>>, %arg4: memref<128x512xbf16, #tpu.memory_space<vmem>>, %arg5: memref<128x128xbf16, #tpu.memory_space<vmem>>, %arg6: memref<1x128xf32, #tpu.memory_space<vmem>>, %arg7: memref<128x128xf32, #tpu.memory_space<vmem>>, %arg8: memref<128x512xf32, #tpu.memory_space<vmem>>, %arg9: memref<128x128xf32, #tpu.memory_space<vmem>>, %arg10: memref<16x128xf32, #tpu.memory_space<vmem>>, %arg11: memref<16x128xf32, #tpu.memory_space<vmem>>) attributes {dimension_semantics = [#tpu.dimension_semantics<arbitrary>], iteration_bounds = array<i64: 2>, scalar_prefetch = 0 : i64, scratch_operands = 4 : i64, tpu.core_type = #tpu.core_type<tc>, window_params = [{transform_indices = @transform_0, window_bounds = array<i64: 128, 32>}, {pipeline_mode = #tpu.pipeline_mode<synchronous>, transform_indices = @transform_1, window_bounds = array<i64: 32, 512>}, {pipeline_mode = #tpu.pipeline_mode<synchronous>, transform_indices = @transform_2, window_bounds = array<i64: 1, 512>}, {pipeline_mode = #tpu.pipeline_mode<synchronous>, transform_indices = @transform_3, window_bounds = array<i64: 128, 512>}, {pipeline_mode = #tpu.pipeline_mode<synchronous>, transform_indices = @transform_4, window_bounds = array<i64: 128, 128>}, {pipeline_mode = #tpu.pipeline_mode<synchronous>, transform_indices = @transform_5, window_bounds = array<i64: 1, 128>}, {transform_indices = @transform_6, window_bounds = array<i64: 128, 128>}]} {
    %c0_i32 = arith.constant 0 : i32
    %0 = arith.cmpi eq, %arg0, %c0_i32 : i32
    %1 = arith.extui %0 : i1 to i32
    %c0_i32_0 = arith.constant 0 : i32
    %2 = arith.cmpi ne, %1, %c0_i32_0 : i32
    scf.if %2 {
      %cst_82 = arith.constant 0.000000e+00 : f32
      %199 = vector.broadcast %cst_82 : f32 to vector<16x128xf32>
      %c0_83 = arith.constant 0 : index
      %c0_84 = arith.constant 0 : index
      %200 = vector.load %arg10[%c0_83, %c0_84] : memref<16x128xf32, #tpu.memory_space<vmem>>, vector<16x128xf32>
      tpu.vector_store %arg10[%c0_83, %c0_84], %199 {strides = array<i32>} : memref<16x128xf32, #tpu.memory_space<vmem>>, vector<16x128xf32>,
      %cst_85 = arith.constant 0.000000e+00 : f32
      %201 = vector.broadcast %cst_85 : f32 to vector<16x128xf32>
      %c0_86 = arith.constant 0 : index
      %c0_87 = arith.constant 0 : index
      %202 = vector.load %arg11[%c0_86, %c0_87] : memref<16x128xf32, #tpu.memory_space<vmem>>, vector<16x128xf32>
      tpu.vector_store %arg11[%c0_86, %c0_87], %201 {strides = array<i32>} : memref<16x128xf32, #tpu.memory_space<vmem>>, vector<16x128xf32>,
    } else {
    }
    %c0 = arith.constant 0 : index
    %c0_1 = arith.constant 0 : index
    %3 = vector.load %arg1[%c0, %c0_1] : memref<128x32xf32, #tpu.memory_space<vmem>>, vector<128x32xf32>
    %4 = arith.truncf %3 : vector<128x32xf32> to vector<128x32xbf16>
    %c0_2 = arith.constant 0 : index
    %c0_3 = arith.constant 0 : index
    %5 = vector.load %arg2[%c0_2, %c0_3] : memref<32x512xbf16, #tpu.memory_space<vmem>>, vector<32x512xbf16>
    %cst = arith.constant dense<0.000000e+00> : vector<128x512xf32>
    %6 = tpu.matmul %4, %5, %cst {dimension_numbers = #tpu.dot_dimension_numbers<[1], [0], [0], [1], [0, 0, 1, 1], [], []>} : vector<128x32xbf16>, vector<32x512xbf16>, vector<128x512xf32> -> vector<128x512xf32>
    %c0_4 = arith.constant 0 : index
    %c0_5 = arith.constant 0 : index
    %7 = vector.load %arg3[%c0_4, %c0_5] : memref<1x512xf32, #tpu.memory_space<vmem>>, vector<1x512xf32>
    %8 = vector.broadcast %7 : vector<1x512xf32> to vector<128x512xf32>
    %9 = arith.addf %6, %8 : vector<128x512xf32>
    %c0_6 = arith.constant 0 : index
    %c0_7 = arith.constant 0 : index
    %10 = vector.load %arg8[%c0_6, %c0_7] : memref<128x512xf32, #tpu.memory_space<vmem>>, vector<128x512xf32>
    tpu.vector_store %arg8[%c0_6, %c0_7], %9 {strides = array<i32>} : memref<128x512xf32, #tpu.memory_space<vmem>>, vector<128x512xf32>,
    %c0_8 = arith.constant 0 : index
    %c0_9 = arith.constant 0 : index
    %11 = vector.load %arg10[%c0_8, %c0_9] : memref<16x128xf32, #tpu.memory_space<vmem>>, vector<16x128xf32>
    %c0_10 = arith.constant 0 : index
    %c0_11 = arith.constant 0 : index
    %12 = vector.load %arg11[%c0_10, %c0_11] : memref<16x128xf32, #tpu.memory_space<vmem>>, vector<16x128xf32>
    %13 = arith.truncf %11 : vector<16x128xf32> to vector<16x128xbf16>
    %c0_12 = arith.constant 0 : index
    %c0_13 = arith.constant 0 : index
    %14 = vector.load %arg4[%c0_12, %c0_13] : memref<128x512xbf16, #tpu.memory_space<vmem>>, vector<128x512xbf16>
    %cst_14 = arith.constant dense<0.000000e+00> : vector<16x512xf32>
    %15 = tpu.matmul %13, %14, %cst_14 {dimension_numbers = #tpu.dot_dimension_numbers<[1], [0], [0], [1], [0, 0, 1, 1], [], []>} : vector<16x128xbf16>, vector<128x512xbf16>, vector<16x512xf32> -> vector<16x512xf32>
    %c0_15 = arith.constant 0 : index
    %c0_16 = arith.constant 0 : index
    %16 = vector.load %arg8[%c0_15, %c0_16] : memref<128x512xf32, #tpu.memory_space<vmem>>, vector<16x512xf32>
    %17 = arith.addf %16, %15 : vector<16x512xf32>
    %18 = vector.extract_strided_slice %17 {offsets = [0, 0], sizes = [16, 384], strides = [1, 1]} : vector<16x512xf32> to vector<16x384xf32>
    %19 = arith.negf %18 : vector<16x384xf32>
    %20 = math.exp %19 : vector<16x384xf32>
    %cst_17 = arith.constant 1.000000e+00 : f32
    %21 = vector.broadcast %cst_17 : f32 to vector<16x384xf32>
    %22 = arith.addf %21, %20 : vector<16x384xf32>
    %23 = arith.divf %21, %22 : vector<16x384xf32>
    %24 = vector.extract_strided_slice %23 {offsets = [0, 0], sizes = [16, 128], strides = [1, 1]} : vector<16x384xf32> to vector<16x128xf32>
    %25 = vector.extract_strided_slice %23 {offsets = [0, 128], sizes = [16, 128], strides = [1, 1]} : vector<16x384xf32> to vector<16x128xf32>
    %26 = vector.extract_strided_slice %23 {offsets = [0, 256], sizes = [16, 128], strides = [1, 1]} : vector<16x384xf32> to vector<16x128xf32>
    %27 = vector.extract_strided_slice %17 {offsets = [0, 384], sizes = [16, 128], strides = [1, 1]} : vector<16x512xf32> to vector<16x128xf32>
    %28 = math.tanh %27 : vector<16x128xf32>
    %29 = arith.mulf %25, %28 : vector<16x128xf32>
    %30 = arith.mulf %24, %12 : vector<16x128xf32>
    %31 = arith.addf %29, %30 : vector<16x128xf32>
    %32 = math.tanh %31 : vector<16x128xf32>
    %33 = arith.mulf %26, %32 : vector<16x128xf32>
    %c0_18 = arith.constant 0 : index
    %c0_19 = arith.constant 0 : index
    %34 = vector.load %arg9[%c0_18, %c0_19] : memref<128x128xf32, #tpu.memory_space<vmem>>, vector<16x128xf32>
    tpu.vector_store %arg9[%c0_18, %c0_19], %33 {strides = array<i32>} : memref<128x128xf32, #tpu.memory_space<vmem>>, vector<16x128xf32>,
    %35 = arith.truncf %33 : vector<16x128xf32> to vector<16x128xbf16>
    %c0_20 = arith.constant 0 : index
    %c0_21 = arith.constant 0 : index
    %36 = vector.load %arg4[%c0_20, %c0_21] : memref<128x512xbf16, #tpu.memory_space<vmem>>, vector<128x512xbf16>
    %cst_22 = arith.constant dense<0.000000e+00> : vector<16x512xf32>
    %37 = tpu.matmul %35, %36, %cst_22 {dimension_numbers = #tpu.dot_dimension_numbers<[1], [0], [0], [1], [0, 0, 1, 1], [], []>} : vector<16x128xbf16>, vector<128x512xbf16>, vector<16x512xf32> -> vector<16x512xf32>
    %c16 = arith.constant 16 : index
    %c0_23 = arith.constant 0 : index
    %38 = vector.load %arg8[%c16, %c0_23] : memref<128x512xf32, #tpu.memory_space<vmem>>, vector<16x512xf32>
    %39 = arith.addf %38, %37 : vector<16x512xf32>
    %40 = vector.extract_strided_slice %39 {offsets = [0, 0], sizes = [16, 384], strides = [1, 1]} : vector<16x512xf32> to vector<16x384xf32>
    %41 = arith.negf %40 : vector<16x384xf32>
    %42 = math.exp %41 : vector<16x384xf32>
    %cst_24 = arith.constant 1.000000e+00 : f32
    %43 = vector.broadcast %cst_24 : f32 to vector<16x384xf32>
    %44 = arith.addf %43, %42 : vector<16x384xf32>
    %45 = arith.divf %43, %44 : vector<16x384xf32>
    %46 = vector.extract_strided_slice %45 {offsets = [0, 0], sizes = [16, 128], strides = [1, 1]} : vector<16x384xf32> to vector<16x128xf32>
    %47 = vector.extract_strided_slice %45 {offsets = [0, 128], sizes = [16, 128], strides = [1, 1]} : vector<16x384xf32> to vector<16x128xf32>
    %48 = vector.extract_strided_slice %45 {offsets = [0, 256], sizes = [16, 128], strides = [1, 1]} : vector<16x384xf32> to vector<16x128xf32>
    %49 = vector.extract_strided_slice %39 {offsets = [0, 384], sizes = [16, 128], strides = [1, 1]} : vector<16x512xf32> to vector<16x128xf32>
    %50 = math.tanh %49 : vector<16x128xf32>
    %51 = arith.mulf %47, %50 : vector<16x128xf32>
    %52 = arith.mulf %46, %31 : vector<16x128xf32>
    %53 = arith.addf %51, %52 : vector<16x128xf32>
    %54 = math.tanh %53 : vector<16x128xf32>
    %55 = arith.mulf %48, %54 : vector<16x128xf32>
    %c16_25 = arith.constant 16 : index
    %c0_26 = arith.constant 0 : index
    %56 = vector.load %arg9[%c16_25, %c0_26] : memref<128x128xf32, #tpu.memory_space<vmem>>, vector<16x128xf32>
    tpu.vector_store %arg9[%c16_25, %c0_26], %55 {strides = array<i32>} : memref<128x128xf32, #tpu.memory_space<vmem>>, vector<16x128xf32>,
    %57 = arith.truncf %55 : vector<16x128xf32> to vector<16x128xbf16>
    %c0_27 = arith.constant 0 : index
    %c0_28 = arith.constant 0 : index
    %58 = vector.load %arg4[%c0_27, %c0_28] : memref<128x512xbf16, #tpu.memory_space<vmem>>, vector<128x512xbf16>
    %cst_29 = arith.constant dense<0.000000e+00> : vector<16x512xf32>
    %59 = tpu.matmul %57, %58, %cst_29 {dimension_numbers = #tpu.dot_dimension_numbers<[1], [0], [0], [1], [0, 0, 1, 1], [], []>} : vector<16x128xbf16>, vector<128x512xbf16>, vector<16x512xf32> -> vector<16x512xf32>
    %c32 = arith.constant 32 : index
    %c0_30 = arith.constant 0 : index
    %60 = vector.load %arg8[%c32, %c0_30] : memref<128x512xf32, #tpu.memory_space<vmem>>, vector<16x512xf32>
    %61 = arith.addf %60, %59 : vector<16x512xf32>
    %62 = vector.extract_strided_slice %61 {offsets = [0, 0], sizes = [16, 384], strides = [1, 1]} : vector<16x512xf32> to vector<16x384xf32>
    %63 = arith.negf %62 : vector<16x384xf32>
    %64 = math.exp %63 : vector<16x384xf32>
    %cst_31 = arith.constant 1.000000e+00 : f32
    %65 = vector.broadcast %cst_31 : f32 to vector<16x384xf32>
    %66 = arith.addf %65, %64 : vector<16x384xf32>
    %67 = arith.divf %65, %66 : vector<16x384xf32>
    %68 = vector.extract_strided_slice %67 {offsets = [0, 0], sizes = [16, 128], strides = [1, 1]} : vector<16x384xf32> to vector<16x128xf32>
    %69 = vector.extract_strided_slice %67 {offsets = [0, 128], sizes = [16, 128], strides = [1, 1]} : vector<16x384xf32> to vector<16x128xf32>
    %70 = vector.extract_strided_slice %67 {offsets = [0, 256], sizes = [16, 128], strides = [1, 1]} : vector<16x384xf32> to vector<16x128xf32>
    %71 = vector.extract_strided_slice %61 {offsets = [0, 384], sizes = [16, 128], strides = [1, 1]} : vector<16x512xf32> to vector<16x128xf32>
    %72 = math.tanh %71 : vector<16x128xf32>
    %73 = arith.mulf %69, %72 : vector<16x128xf32>
    %74 = arith.mulf %68, %53 : vector<16x128xf32>
    %75 = arith.addf %73, %74 : vector<16x128xf32>
    %76 = math.tanh %75 : vector<16x128xf32>
    %77 = arith.mulf %70, %76 : vector<16x128xf32>
    %c32_32 = arith.constant 32 : index
    %c0_33 = arith.constant 0 : index
    %78 = vector.load %arg9[%c32_32, %c0_33] : memref<128x128xf32, #tpu.memory_space<vmem>>, vector<16x128xf32>
    tpu.vector_store %arg9[%c32_32, %c0_33], %77 {strides = array<i32>} : memref<128x128xf32, #tpu.memory_space<vmem>>, vector<16x128xf32>,
    %79 = arith.truncf %77 : vector<16x128xf32> to vector<16x128xbf16>
    %c0_34 = arith.constant 0 : index
    %c0_35 = arith.constant 0 : index
    %80 = vector.load %arg4[%c0_34, %c0_35] : memref<128x512xbf16, #tpu.memory_space<vmem>>, vector<128x512xbf16>
    %cst_36 = arith.constant dense<0.000000e+00> : vector<16x512xf32>
    %81 = tpu.matmul %79, %80, %cst_36 {dimension_numbers = #tpu.dot_dimension_numbers<[1], [0], [0], [1], [0, 0, 1, 1], [], []>} : vector<16x128xbf16>, vector<128x512xbf16>, vector<16x512xf32> -> vector<16x512xf32>
    %c48 = arith.constant 48 : index
    %c0_37 = arith.constant 0 : index
    %82 = vector.load %arg8[%c48, %c0_37] : memref<128x512xf32, #tpu.memory_space<vmem>>, vector<16x512xf32>
    %83 = arith.addf %82, %81 : vector<16x512xf32>
    %84 = vector.extract_strided_slice %83 {offsets = [0, 0], sizes = [16, 384], strides = [1, 1]} : vector<16x512xf32> to vector<16x384xf32>
    %85 = arith.negf %84 : vector<16x384xf32>
    %86 = math.exp %85 : vector<16x384xf32>
    %cst_38 = arith.constant 1.000000e+00 : f32
    %87 = vector.broadcast %cst_38 : f32 to vector<16x384xf32>
    %88 = arith.addf %87, %86 : vector<16x384xf32>
    %89 = arith.divf %87, %88 : vector<16x384xf32>
    %90 = vector.extract_strided_slice %89 {offsets = [0, 0], sizes = [16, 128], strides = [1, 1]} : vector<16x384xf32> to vector<16x128xf32>
    %91 = vector.extract_strided_slice %89 {offsets = [0, 128], sizes = [16, 128], strides = [1, 1]} : vector<16x384xf32> to vector<16x128xf32>
    %92 = vector.extract_strided_slice %89 {offsets = [0, 256], sizes = [16, 128], strides = [1, 1]} : vector<16x384xf32> to vector<16x128xf32>
    %93 = vector.extract_strided_slice %83 {offsets = [0, 384], sizes = [16, 128], strides = [1, 1]} : vector<16x512xf32> to vector<16x128xf32>
    %94 = math.tanh %93 : vector<16x128xf32>
    %95 = arith.mulf %91, %94 : vector<16x128xf32>
    %96 = arith.mulf %90, %75 : vector<16x128xf32>
    %97 = arith.addf %95, %96 : vector<16x128xf32>
    %98 = math.tanh %97 : vector<16x128xf32>
    %99 = arith.mulf %92, %98 : vector<16x128xf32>
    %c48_39 = arith.constant 48 : index
    %c0_40 = arith.constant 0 : index
    %100 = vector.load %arg9[%c48_39, %c0_40] : memref<128x128xf32, #tpu.memory_space<vmem>>, vector<16x128xf32>
    tpu.vector_store %arg9[%c48_39, %c0_40], %99 {strides = array<i32>} : memref<128x128xf32, #tpu.memory_space<vmem>>, vector<16x128xf32>,
    %101 = arith.truncf %99 : vector<16x128xf32> to vector<16x128xbf16>
    %c0_41 = arith.constant 0 : index
    %c0_42 = arith.constant 0 : index
    %102 = vector.load %arg4[%c0_41, %c0_42] : memref<128x512xbf16, #tpu.memory_space<vmem>>, vector<128x512xbf16>
    %cst_43 = arith.constant dense<0.000000e+00> : vector<16x512xf32>
    %103 = tpu.matmul %101, %102, %cst_43 {dimension_numbers = #tpu.dot_dimension_numbers<[1], [0], [0], [1], [0, 0, 1, 1], [], []>} : vector<16x128xbf16>, vector<128x512xbf16>, vector<16x512xf32> -> vector<16x512xf32>
    %c64 = arith.constant 64 : index
    %c0_44 = arith.constant 0 : index
    %104 = vector.load %arg8[%c64, %c0_44] : memref<128x512xf32, #tpu.memory_space<vmem>>, vector<16x512xf32>
    %105 = arith.addf %104, %103 : vector<16x512xf32>
    %106 = vector.extract_strided_slice %105 {offsets = [0, 0], sizes = [16, 384], strides = [1, 1]} : vector<16x512xf32> to vector<16x384xf32>
    %107 = arith.negf %106 : vector<16x384xf32>
    %108 = math.exp %107 : vector<16x384xf32>
    %cst_45 = arith.constant 1.000000e+00 : f32
    %109 = vector.broadcast %cst_45 : f32 to vector<16x384xf32>
    %110 = arith.addf %109, %108 : vector<16x384xf32>
    %111 = arith.divf %109, %110 : vector<16x384xf32>
    %112 = vector.extract_strided_slice %111 {offsets = [0, 0], sizes = [16, 128], strides = [1, 1]} : vector<16x384xf32> to vector<16x128xf32>
    %113 = vector.extract_strided_slice %111 {offsets = [0, 128], sizes = [16, 128], strides = [1, 1]} : vector<16x384xf32> to vector<16x128xf32>
    %114 = vector.extract_strided_slice %111 {offsets = [0, 256], sizes = [16, 128], strides = [1, 1]} : vector<16x384xf32> to vector<16x128xf32>
    %115 = vector.extract_strided_slice %105 {offsets = [0, 384], sizes = [16, 128], strides = [1, 1]} : vector<16x512xf32> to vector<16x128xf32>
    %116 = math.tanh %115 : vector<16x128xf32>
    %117 = arith.mulf %113, %116 : vector<16x128xf32>
    %118 = arith.mulf %112, %97 : vector<16x128xf32>
    %119 = arith.addf %117, %118 : vector<16x128xf32>
    %120 = math.tanh %119 : vector<16x128xf32>
    %121 = arith.mulf %114, %120 : vector<16x128xf32>
    %c64_46 = arith.constant 64 : index
    %c0_47 = arith.constant 0 : index
    %122 = vector.load %arg9[%c64_46, %c0_47] : memref<128x128xf32, #tpu.memory_space<vmem>>, vector<16x128xf32>
    tpu.vector_store %arg9[%c64_46, %c0_47], %121 {strides = array<i32>} : memref<128x128xf32, #tpu.memory_space<vmem>>, vector<16x128xf32>,
    %123 = arith.truncf %121 : vector<16x128xf32> to vector<16x128xbf16>
    %c0_48 = arith.constant 0 : index
    %c0_49 = arith.constant 0 : index
    %124 = vector.load %arg4[%c0_48, %c0_49] : memref<128x512xbf16, #tpu.memory_space<vmem>>, vector<128x512xbf16>
    %cst_50 = arith.constant dense<0.000000e+00> : vector<16x512xf32>
    %125 = tpu.matmul %123, %124, %cst_50 {dimension_numbers = #tpu.dot_dimension_numbers<[1], [0], [0], [1], [0, 0, 1, 1], [], []>} : vector<16x128xbf16>, vector<128x512xbf16>, vector<16x512xf32> -> vector<16x512xf32>
    %c80 = arith.constant 80 : index
    %c0_51 = arith.constant 0 : index
    %126 = vector.load %arg8[%c80, %c0_51] : memref<128x512xf32, #tpu.memory_space<vmem>>, vector<16x512xf32>
    %127 = arith.addf %126, %125 : vector<16x512xf32>
    %128 = vector.extract_strided_slice %127 {offsets = [0, 0], sizes = [16, 384], strides = [1, 1]} : vector<16x512xf32> to vector<16x384xf32>
    %129 = arith.negf %128 : vector<16x384xf32>
    %130 = math.exp %129 : vector<16x384xf32>
    %cst_52 = arith.constant 1.000000e+00 : f32
    %131 = vector.broadcast %cst_52 : f32 to vector<16x384xf32>
    %132 = arith.addf %131, %130 : vector<16x384xf32>
    %133 = arith.divf %131, %132 : vector<16x384xf32>
    %134 = vector.extract_strided_slice %133 {offsets = [0, 0], sizes = [16, 128], strides = [1, 1]} : vector<16x384xf32> to vector<16x128xf32>
    %135 = vector.extract_strided_slice %133 {offsets = [0, 128], sizes = [16, 128], strides = [1, 1]} : vector<16x384xf32> to vector<16x128xf32>
    %136 = vector.extract_strided_slice %133 {offsets = [0, 256], sizes = [16, 128], strides = [1, 1]} : vector<16x384xf32> to vector<16x128xf32>
    %137 = vector.extract_strided_slice %127 {offsets = [0, 384], sizes = [16, 128], strides = [1, 1]} : vector<16x512xf32> to vector<16x128xf32>
    %138 = math.tanh %137 : vector<16x128xf32>
    %139 = arith.mulf %135, %138 : vector<16x128xf32>
    %140 = arith.mulf %134, %119 : vector<16x128xf32>
    %141 = arith.addf %139, %140 : vector<16x128xf32>
    %142 = math.tanh %141 : vector<16x128xf32>
    %143 = arith.mulf %136, %142 : vector<16x128xf32>
    %c80_53 = arith.constant 80 : index
    %c0_54 = arith.constant 0 : index
    %144 = vector.load %arg9[%c80_53, %c0_54] : memref<128x128xf32, #tpu.memory_space<vmem>>, vector<16x128xf32>
    tpu.vector_store %arg9[%c80_53, %c0_54], %143 {strides = array<i32>} : memref<128x128xf32, #tpu.memory_space<vmem>>, vector<16x128xf32>,
    %145 = arith.truncf %143 : vector<16x128xf32> to vector<16x128xbf16>
    %c0_55 = arith.constant 0 : index
    %c0_56 = arith.constant 0 : index
    %146 = vector.load %arg4[%c0_55, %c0_56] : memref<128x512xbf16, #tpu.memory_space<vmem>>, vector<128x512xbf16>
    %cst_57 = arith.constant dense<0.000000e+00> : vector<16x512xf32>
    %147 = tpu.matmul %145, %146, %cst_57 {dimension_numbers = #tpu.dot_dimension_numbers<[1], [0], [0], [1], [0, 0, 1, 1], [], []>} : vector<16x128xbf16>, vector<128x512xbf16>, vector<16x512xf32> -> vector<16x512xf32>
    %c96 = arith.constant 96 : index
    %c0_58 = arith.constant 0 : index
    %148 = vector.load %arg8[%c96, %c0_58] : memref<128x512xf32, #tpu.memory_space<vmem>>, vector<16x512xf32>
    %149 = arith.addf %148, %147 : vector<16x512xf32>
    %150 = vector.extract_strided_slice %149 {offsets = [0, 0], sizes = [16, 384], strides = [1, 1]} : vector<16x512xf32> to vector<16x384xf32>
    %151 = arith.negf %150 : vector<16x384xf32>
    %152 = math.exp %151 : vector<16x384xf32>
    %cst_59 = arith.constant 1.000000e+00 : f32
    %153 = vector.broadcast %cst_59 : f32 to vector<16x384xf32>
    %154 = arith.addf %153, %152 : vector<16x384xf32>
    %155 = arith.divf %153, %154 : vector<16x384xf32>
    %156 = vector.extract_strided_slice %155 {offsets = [0, 0], sizes = [16, 128], strides = [1, 1]} : vector<16x384xf32> to vector<16x128xf32>
    %157 = vector.extract_strided_slice %155 {offsets = [0, 128], sizes = [16, 128], strides = [1, 1]} : vector<16x384xf32> to vector<16x128xf32>
    %158 = vector.extract_strided_slice %155 {offsets = [0, 256], sizes = [16, 128], strides = [1, 1]} : vector<16x384xf32> to vector<16x128xf32>
    %159 = vector.extract_strided_slice %149 {offsets = [0, 384], sizes = [16, 128], strides = [1, 1]} : vector<16x512xf32> to vector<16x128xf32>
    %160 = math.tanh %159 : vector<16x128xf32>
    %161 = arith.mulf %157, %160 : vector<16x128xf32>
    %162 = arith.mulf %156, %141 : vector<16x128xf32>
    %163 = arith.addf %161, %162 : vector<16x128xf32>
    %164 = math.tanh %163 : vector<16x128xf32>
    %165 = arith.mulf %158, %164 : vector<16x128xf32>
    %c96_60 = arith.constant 96 : index
    %c0_61 = arith.constant 0 : index
    %166 = vector.load %arg9[%c96_60, %c0_61] : memref<128x128xf32, #tpu.memory_space<vmem>>, vector<16x128xf32>
    tpu.vector_store %arg9[%c96_60, %c0_61], %165 {strides = array<i32>} : memref<128x128xf32, #tpu.memory_space<vmem>>, vector<16x128xf32>,
    %167 = arith.truncf %165 : vector<16x128xf32> to vector<16x128xbf16>
    %c0_62 = arith.constant 0 : index
    %c0_63 = arith.constant 0 : index
    %168 = vector.load %arg4[%c0_62, %c0_63] : memref<128x512xbf16, #tpu.memory_space<vmem>>, vector<128x512xbf16>
    %cst_64 = arith.constant dense<0.000000e+00> : vector<16x512xf32>
    %169 = tpu.matmul %167, %168, %cst_64 {dimension_numbers = #tpu.dot_dimension_numbers<[1], [0], [0], [1], [0, 0, 1, 1], [], []>} : vector<16x128xbf16>, vector<128x512xbf16>, vector<16x512xf32> -> vector<16x512xf32>
    %c112 = arith.constant 112 : index
    %c0_65 = arith.constant 0 : index
    %170 = vector.load %arg8[%c112, %c0_65] : memref<128x512xf32, #tpu.memory_space<vmem>>, vector<16x512xf32>
    %171 = arith.addf %170, %169 : vector<16x512xf32>
    %172 = vector.extract_strided_slice %171 {offsets = [0, 0], sizes = [16, 384], strides = [1, 1]} : vector<16x512xf32> to vector<16x384xf32>
    %173 = arith.negf %172 : vector<16x384xf32>
    %174 = math.exp %173 : vector<16x384xf32>
    %cst_66 = arith.constant 1.000000e+00 : f32
    %175 = vector.broadcast %cst_66 : f32 to vector<16x384xf32>
    %176 = arith.addf %175, %174 : vector<16x384xf32>
    %177 = arith.divf %175, %176 : vector<16x384xf32>
    %178 = vector.extract_strided_slice %177 {offsets = [0, 0], sizes = [16, 128], strides = [1, 1]} : vector<16x384xf32> to vector<16x128xf32>
    %179 = vector.extract_strided_slice %177 {offsets = [0, 128], sizes = [16, 128], strides = [1, 1]} : vector<16x384xf32> to vector<16x128xf32>
    %180 = vector.extract_strided_slice %177 {offsets = [0, 256], sizes = [16, 128], strides = [1, 1]} : vector<16x384xf32> to vector<16x128xf32>
    %181 = vector.extract_strided_slice %171 {offsets = [0, 384], sizes = [16, 128], strides = [1, 1]} : vector<16x512xf32> to vector<16x128xf32>
    %182 = math.tanh %181 : vector<16x128xf32>
    %183 = arith.mulf %179, %182 : vector<16x128xf32>
    %184 = arith.mulf %178, %163 : vector<16x128xf32>
    %185 = arith.addf %183, %184 : vector<16x128xf32>
    %186 = math.tanh %185 : vector<16x128xf32>
    %187 = arith.mulf %180, %186 : vector<16x128xf32>
    %c112_67 = arith.constant 112 : index
    %c0_68 = arith.constant 0 : index
    %188 = vector.load %arg9[%c112_67, %c0_68] : memref<128x128xf32, #tpu.memory_space<vmem>>, vector<16x128xf32>
    tpu.vector_store %arg9[%c112_67, %c0_68], %187 {strides = array<i32>} : memref<128x128xf32, #tpu.memory_space<vmem>>, vector<16x128xf32>,
    %c0_69 = arith.constant 0 : index
    %c0_70 = arith.constant 0 : index
    %189 = vector.load %arg10[%c0_69, %c0_70] : memref<16x128xf32, #tpu.memory_space<vmem>>, vector<16x128xf32>
    tpu.vector_store %arg10[%c0_69, %c0_70], %187 {strides = array<i32>} : memref<16x128xf32, #tpu.memory_space<vmem>>, vector<16x128xf32>,
    %c0_71 = arith.constant 0 : index
    %c0_72 = arith.constant 0 : index
    %190 = vector.load %arg11[%c0_71, %c0_72] : memref<16x128xf32, #tpu.memory_space<vmem>>, vector<16x128xf32>
    tpu.vector_store %arg11[%c0_71, %c0_72], %185 {strides = array<i32>} : memref<16x128xf32, #tpu.memory_space<vmem>>, vector<16x128xf32>,
    %c0_73 = arith.constant 0 : index
    %c0_74 = arith.constant 0 : index
    %191 = vector.load %arg9[%c0_73, %c0_74] : memref<128x128xf32, #tpu.memory_space<vmem>>, vector<128x128xf32>
    %192 = arith.truncf %191 : vector<128x128xf32> to vector<128x128xbf16>
    %c0_75 = arith.constant 0 : index
    %c0_76 = arith.constant 0 : index
    %193 = vector.load %arg5[%c0_75, %c0_76] : memref<128x128xbf16, #tpu.memory_space<vmem>>, vector<128x128xbf16>
    %cst_77 = arith.constant dense<0.000000e+00> : vector<128x128xf32>
    %194 = tpu.matmul %192, %193, %cst_77 {dimension_numbers = #tpu.dot_dimension_numbers<[1], [0], [0], [1], [0, 0, 1, 1], [], []>} : vector<128x128xbf16>, vector<128x128xbf16>, vector<128x128xf32> -> vector<128x128xf32>
    %c0_78 = arith.constant 0 : index
    %c0_79 = arith.constant 0 : index
    %195 = vector.load %arg6[%c0_78, %c0_79] : memref<1x128xf32, #tpu.memory_space<vmem>>, vector<1x128xf32>
    %196 = vector.broadcast %195 : vector<1x128xf32> to vector<128x128xf32>
    %197 = arith.addf %194, %196 : vector<128x128xf32>
    %c0_80 = arith.constant 0 : index
    %c0_81 = arith.constant 0 : index
    %198 = vector.load %arg7[%c0_80, %c0_81] : memref<128x128xf32, #tpu.memory_space<vmem>>, vector<128x128xf32>
    tpu.vector_store %arg7[%c0_80, %c0_81], %197 {strides = array<i32>} : memref<128x128xf32, #tpu.memory_space<vmem>>, vector<128x128xf32>,
    return
  }
  func.func @transform_0(%arg0: i32) -> (i32, i32) {
    %c0_i32 = arith.constant 0 : i32
    %c0_i32_0 = arith.constant 0 : i32
    return %arg0, %c0_i32 : i32, i32
  }
  func.func @transform_1(%arg0: i32) -> (i32, i32) {
    %c0_i32 = arith.constant 0 : i32
    %c0_i32_0 = arith.constant 0 : i32
    %c0_i32_1 = arith.constant 0 : i32
    return %c0_i32, %c0_i32_0 : i32, i32
  }
  func.func @transform_2(%arg0: i32) -> (i32, i32) {
    %c0_i32 = arith.constant 0 : i32
    %c0_i32_0 = arith.constant 0 : i32
    %c0_i32_1 = arith.constant 0 : i32
    return %c0_i32, %c0_i32_0 : i32, i32
  }
  func.func @transform_3(%arg0: i32) -> (i32, i32) {
    %c0_i32 = arith.constant 0 : i32
    %c0_i32_0 = arith.constant 0 : i32
    %c0_i32_1 = arith.constant 0 : i32
    return %c0_i32, %c0_i32_0 : i32, i32
  }
  func.func @transform_4(%arg0: i32) -> (i32, i32) {
    %c0_i32 = arith.constant 0 : i32
    %c0_i32_0 = arith.constant 0 : i32
    %c0_i32_1 = arith.constant 0 : i32
    return %c0_i32, %c0_i32_0 : i32, i32
  }
  func.func @transform_5(%arg0: i32) -> (i32, i32) {
    %c0_i32 = arith.constant 0 : i32
    %c0_i32_0 = arith.constant 0 : i32
    %c0_i32_1 = arith.constant 0 : i32
    return %c0_i32, %c0_i32_0 : i32, i32
  }
  func.func @transform_6(%arg0: i32) -> (i32, i32) {
    %c0_i32 = arith.constant 0 : i32
    %c0_i32_0 = arith.constant 0 : i32
    return %arg0, %c0_i32 : i32, i32
  }
}

</mosaic_0001>

<bundles_post_ra>
// kernel: qlstm_forward.1
= control target key start
LH: loop header
LB: loop body
LE: loop exit
PB: predicated region body
PF: predicated region fallthrough
CT: control target
= control target key end

     0   :  { %s4685_s21 = smov 0   ;;  %s5708_s0 = inlined_call_operand.vmem [shape: f32[256,32], index: 0, kind: input, shape index: {}]   ;;  %s5709_s1 = inlined_call_operand.vmem [shape: bf16[32,512], index: 1, kind: input, shape index: {}]   ;;  %s5710_s2 = inlined_call_operand.vmem [shape: f32[1,512], index: 2, kind: input, shape index: {}]   ;;  %s5711_s3 = inlined_call_operand.vmem [shape: bf16[128,512], index: 3, kind: input, shape index: {}]   ;;  %s5712_s4 = inlined_call_operand.vmem [shape: bf16[128,128], index: 4, kind: input, shape index: {}]   ;;  %s5713_s5 = inlined_call_operand.vmem [shape: f32[1,128], index: 5, kind: input, shape index: {}]   ;;  %s5714_s6 = inlined_call_operand.vmem [shape: f32[256,128], index: 6, kind: output, shape index: {}]  }
   0x1 LB: > { %s3705_s22 = sadd.s32 4294967295, %s4646_s21   ;;  %p3709_p0 = scmp.ge.s32.totalorder %s4646_s21, 1  ;;  %s4646_s21 = sphi %s4685_s21, %s16_s21  }
   0x2   : > { %p213_p1 = scmp.lt.s32.totalorder %s4646_s21, 3 }
   0x4   : > { %p214_p2 = pnand %p3709_p0, %p213_p1 }
   0x6   : > { %217 = sbr.rel (%p214_p2) target bundleno = 2441 (0x989), region = 44 }
   0xd   : > { %s3710_s23 = sshll.u32 %s3705_s22, 4  ;;  %p3714_p4 = scmp.ne.s32.totalorder %s3705_s22, 0 }
   0xe   : > { %p244_p3 = scmp.lt.s32.totalorder %s3710_s23, 31  ;;  %v4648_v0 = vmov (!%p3714_p4), 0.0  }
   0xf   : > { %259 = sbr.rel (%p3714_p4) target bundleno = 22 (0x16), region = 48  ;;  %260 = vst [vmem:[#allocation4] sm:$0xff] (!%p3714_p4), %v4648_v0  ;;  %261 = vst [vmem:[#allocation4 + $0x8] sm:$0xff] (!%p3714_p4), %v4648_v0 }
  0x10   : > { %s5748_s23 = smov (!%p244_p3, %s3710_s23), 31  ;;  %262 = vst [vmem:[#allocation5] sm:$0xff] (!%p3714_p4), %v4648_v0  ;;  %263 = vst [vmem:[#allocation5 + $0x8] sm:$0xff] (!%p3714_p4), %v4648_v0 }
  0x11   : > { %s3711_s24 = sshll.u32 %s5748_s23, 3 }
  0x12   : > { %s4696_s27 = scalar_lea.vmem %s5708_s0, %s3711_s24  ;;  %s4701_s30 = scalar_lea.vmem %s5714_s6, %s3711_s24 }
  0x16 PF: > { %v4244_v1 = vld [vmem:[%s5709_s1 + $0x4] ss:$16 sps:$4 sm:$0xff]   ;;  %v4246_v2 = vld [vmem:[%s5709_s1] ss:$16 sps:$4 sm:$0xff]   ;;  %v5715_v3 = vmov 0   ;;  %v273_v7 = vld [vmem:[%s4696_s27 + $0x48] sm:$0xff] }
  0x17   : > { %455 = vmatprep.mubr.bf16.mxu1 %v5715_v3  ;;  %415 = vmatprep.mubr.bf16.mxu0 %v5715_v3  ;;  %v4247_v4 = vld [vmem:[%s5709_s1 + $0x24] ss:$16 sps:$4 sm:$0xff]   ;;  %v4249_v5 = vld [vmem:[%s5709_s1 + $0x20] ss:$16 sps:$4 sm:$0xff]   ;;  %v4252_v8 = vld [vmem:[%s5709_s1 + $0xc] ss:$16 sps:$4 sm:$0xff]  }
  0x18   : > { %4102 = vmatprep.subr.bf16.mxu1 %v4244_v1  ;;  %v272_v6 = vld [vmem:[%s4696_s27 + $0x40] sm:$0xff]  ;;  %383 = vmatprep.subr.bf16.mxu0 %v4244_v1  ;;  %v265_v10 = vld [vmem:[%s4696_s27 + $0x8] sm:$0xff]  ;;  %vm358_vm0 = vcmask 261120   ;;  %v274_v16 = vld [vmem:[%s4696_s27 + $0x50] sm:$0xff] }
  0x19   : > { %4104 = vmatpush1.bf16.msra.mxu1 %v4246_v2  ;;  %384 = vmatpush1.bf16.msra.mxu0 %v4246_v2  ;;  %v264_v9 = vld [vmem:[%s4696_s27] sm:$0xff]  ;;  %v4724_v11 = vpack.c.bf16 %v273_v7, %v272_v6  ;;  %v4250_v13 = vld [vmem:[%s5709_s1 + $0x8] ss:$16 sps:$4 sm:$0xff]   ;;  %v4258_v18 = vld [vmem:[%s5709_s1 + $0x2c] ss:$16 sps:$4 sm:$0xff]  }
  0x1a   : > { %4103 = vmatprep.subr.bf16.mxu1 %v4247_v4  ;;  %385 = vmatprep.subr.bf16.mxu0 %v4247_v4  ;;  %v4726_v12 = vpack.c.bf16 %v265_v10, %v264_v9  ;;  %v4734_v14 = vld [vmem:[%s5711_s3 + $0x4] ss:$16 sps:$4 sm:$0xff]   ;;  %v4739_v15 = vld [vmem:[%s5711_s3] ss:$16 sps:$4 sm:$0xff]   ;;  %v275_v17 = vld [vmem:[%s4696_s27 + $0x58] sm:$0xff] }
  0x1b   : > { %v4256_v19 = vld [vmem:[%s5709_s1 + $0x28] ss:$16 sps:$4 sm:$0xff]   ;;  %v4757_v20 = vld [vmem:[%s5711_s3 + $0x24] ss:$16 sps:$4 sm:$0xff]   ;;  %v4766_v23 = vld [vmem:[%s5711_s3 + $0x20] ss:$16 sps:$4 sm:$0xff]   ;;  %v4775_v25 = vpack.c.bf16 %v275_v17, %v274_v16 }
  0x1c   : > { %v266_v21 = vld [vmem:[%s4696_s27 + $0x10] sm:$0xff]  ;;  %v267_v22 = vld [vmem:[%s4696_s27 + $0x18] sm:$0xff]  ;;  %v276_v30 = vld [vmem:[%s4696_s27 + $0x60] sm:$0xff] }
  0x1d   : > { %4105 = vmatpush1.bf16.msra.mxu1 %v4249_v5  ;;  %386 = vmatpush1.bf16.msra.mxu0 %v4249_v5  ;;  %v4773_v24 = vld [vmem:[%s5711_s3 + $0x44] ss:$16 sps:$4 sm:$0xff]   ;;  %v4777_v26 = vpack.c.bf16 %v267_v22, %v266_v21  ;;  %v4783_v27 = vld [vmem:[%s5711_s3 + $0x40] ss:$16 sps:$4 sm:$0xff]   ;;  %v4794_v29 = vld [vmem:[%s5711_s3 + $0xc] ss:$16 sps:$4 sm:$0xff]  }
  0x1e   : > { %496 = vmatprep.subr.bf16.mxu1 %v4252_v8  ;;  %870 = vmatprep.subr.bf16.mxu0 %v4734_v14  ;;  %v4789_v28 = vld [vmem:[%s5711_s3 + $0x64] ss:$16 sps:$4 sm:$0xff]   ;;  %v277_v31 = vld [vmem:[%s4696_s27 + $0x68] sm:$0xff]  ;;  %v4810_v34 = vld [vmem:[%s5711_s3 + $0x60] ss:$16 sps:$4 sm:$0xff]  }
  0x1f   : > { %v268_v32 = vld [vmem:[%s4696_s27 + $0x20] sm:$0xff]  ;;  %v269_v33 = vld [vmem:[%s4696_s27 + $0x28] sm:$0xff]  ;;  %v4819_v36 = vpack.c.bf16 %v277_v31, %v276_v30  ;;  %v278_v39 = vld [vmem:[%s4696_s27 + $0x70] sm:$0xff] }
  0x20   : > { %3727 = vmatmul.mubr.msk.bf16.vlgmr.msra.gmra.mrb[0].mxu1 %vm358_vm0, %v4724_v11  ;;  %3723 = vmatmul.mubr.msk.bf16.vlgmr.msra.gmra.mrb[0].mxu0 %vm358_vm0, %v4726_v12  ;;  %v4817_v35 = vld [vmem:[%s5711_s3 + $0x84] ss:$16 sps:$4 sm:$0xff]   ;;  %v4821_v37 = vpack.c.bf16 %v269_v33, %v268_v32  ;;  %v4827_v38 = vld [vmem:[%s5711_s3 + $0x80] ss:$16 sps:$4 sm:$0xff]   ;;  %v279_v40 = vld [vmem:[%s4696_s27 + $0x78] sm:$0xff]  ;;  %v298_v33 = vlaneseq }
  0x21   : > { %497 = vmatpush1.bf16.msra.mxu1 %v4250_v13  ;;  %465 = vmatprep.mubr.bf16.mxu1 %v5715_v3  ;;  %v4835_v41 = vld [vmem:[%s5711_s3 + $0xa4] ss:$16 sps:$4 sm:$0xff]   ;;  %v271_v43 = vld [vmem:[%s4696_s27 + $0x38] sm:$0xff]  ;;  %v4849_v44 = vld [vmem:[%s5711_s3 + $0xa0] ss:$16 sps:$4 sm:$0xff]   ;;  %v4857_v46 = vpack.c.bf16 %v279_v40, %v278_v39 }
  0x22   : > { %498 = vmatprep.subr.bf16.mxu1 %v4258_v18  ;;  %871 = vmatpush1.bf16.msra.mxu0 %v4739_v15  ;;  %v270_v42 = vld [vmem:[%s4696_s27 + $0x30] sm:$0xff]  ;;  %v673_v51 = vld [vmem:[#allocation4] sm:$0xff]  ;;  %v674_v52 = vld [vmem:[#allocation4 + $0x8] sm:$0xff] }
  0x23   : > { %872 = vmatprep.subr.bf16.mxu0 %v4757_v20  ;;  %425 = vmatprep.mubr.bf16.mxu0 %v5715_v3  ;;  %v4855_v45 = vld [vmem:[%s5711_s3 + $0xc4] ss:$16 sps:$4 sm:$0xff]   ;;  %v283_v47 = vpack.c.bf16 %v271_v43, %v270_v42  ;;  %v4863_v48 = vld [vmem:[%s5711_s3 + $0xc0] ss:$16 sps:$4 sm:$0xff]   ;;  %v4885_v53 = vld [vmem:[%s5711_s3 + $0x8] ss:$16 sps:$4 sm:$0xff]   ;;  %v4894_v55 = vpack.c.bf16 %v674_v52, %v673_v51 }
  0x24   : > { %v4868_v49 = vld [vmem:[%s5711_s3 + $0xe4] ss:$16 sps:$4 sm:$0xff]   ;;  %v4877_v50 = vld [vmem:[%s5711_s3 + $0xe0] ss:$16 sps:$4 sm:$0xff]   ;;  %v4891_v54 = vld [vmem:[%s5711_s3 + $0x2c] ss:$16 sps:$4 sm:$0xff]  }
  0x25   : > { %499 = vmatpush1.bf16.msra.mxu1 %v4256_v19  ;;  %v4899_v56 = vld [vmem:[%s5711_s3 + $0x28] ss:$16 sps:$4 sm:$0xff]   ;;  %v4907_v57 = vld [vmem:[%s5711_s3 + $0x4c] ss:$16 sps:$4 sm:$0xff]   ;;  %v296_v39 = vld [vmem:[%s5710_s2] sm:$0xf] }
  0x26   : > { %873 = vmatpush1.bf16.msra.mxu0 %v4766_v23  ;;  %913 = vmatprep.subr.bf16.mxu1 %v4794_v29  ;;  %v4916_v58 = vld [vmem:[%s5711_s3 + $0x48] ss:$16 sps:$4 sm:$0xff]   ;;  %v4923_v59 = vld [vmem:[%s5711_s3 + $0x6c] ss:$16 sps:$4 sm:$0xff]  }
  0x27   : > { %874 = vmatprep.subr.bf16.mxu0 %v4773_v24  ;;  %v4931_v60 = vld [vmem:[%s5711_s3 + $0x68] ss:$16 sps:$4 sm:$0xff]   ;;  %v4939_v61 = vld [vmem:[%s5711_s3 + $0x8c] ss:$16 sps:$4 sm:$0xff]  }
  0x28   : > { %3728 = vmatmul.mubr.msk.bf16.gmra.mrb[4].mxu1 %vm358_vm0, %v4775_v25  ;;  %3724 = vmatmul.mubr.msk.bf16.gmra.mrb[4].mxu0 %vm358_vm0, %v4777_v26  ;;  %v4951_v62 = vld [vmem:[%s5711_s3 + $0x88] ss:$16 sps:$4 sm:$0xff]   ;;  %v4957_v63 = vld [vmem:[%s5711_s3 + $0xac] ss:$16 sps:$4 sm:$0xff]  }
  0x29   : > { %475 = vmatprep.mubr.bf16.mxu1 %v5715_v3  ;;  %435 = vmatprep.mubr.bf16.mxu0 %v5715_v3  ;;  %v4968_v0 = vld [vmem:[%s5711_s3 + $0xa8] ss:$16 sps:$4 sm:$0xff]   ;;  %v4974_v1 = vld [vmem:[%s5711_s3 + $0xcc] ss:$16 sps:$4 sm:$0xff]  }
  0x2a   : > { %875 = vmatpush1.bf16.msra.mxu0 %v4783_v27  ;;  %v4982_v2 = vld [vmem:[%s5711_s3 + $0xc8] ss:$16 sps:$4 sm:$0xff]   ;;  %v4988_v4 = vld [vmem:[%s5711_s3 + $0xec] ss:$16 sps:$4 sm:$0xff]  }
  0x2b   : > { %876 = vmatprep.subr.bf16.mxu0 %v4789_v28  ;;  %v4998_v5 = vld [vmem:[%s5711_s3 + $0xe8] ss:$16 sps:$4 sm:$0xff]  }
  0x2e   : > { %877 = vmatpush1.bf16.msra.mxu0 %v4810_v34 }
  0x2f   : > { %878 = vmatprep.subr.bf16.mxu0 %v4817_v35 }
  0x30   : > { %3729 = vmatmul.mubr.msk.bf16.gmra.mrb[8].mxu1 %vm358_vm0, %v4819_v36  ;;  %3725 = vmatmul.mubr.msk.bf16.gmra.mrb[8].mxu0 %vm358_vm0, %v4821_v37 }
  0x31   : > { %485 = vmatprep.mubr.bf16.mxu1 %v5715_v3  ;;  %445 = vmatprep.mubr.bf16.mxu0 %v5715_v3 }
  0x32   : > { %879 = vmatpush1.bf16.msra.mxu0 %v4827_v38 }
  0x33   : > { %880 = vmatprep.subr.bf16.mxu0 %v4835_v41 }
  0x36   : > { %881 = vmatpush1.bf16.msra.mxu0 %v4849_v44 }
  0x37   : > { %882 = vmatprep.subr.bf16.mxu0 %v4855_v45 }
  0x38   : > { %3730 = vmatmul.mubr.msk.bf16.gmra.mrb[12].mxu1 %vm358_vm0, %v4857_v46  ;;  %3726 = vmatmul.mubr.msk.bf16.gmra.mrb[12].mxu0 %vm358_vm0, %v283_v47 }
  0x39   : > { %528 = vmatprep.mubr.bf16.mxu1 %v5715_v3  ;;  %902 = vmatprep.mubr.bf16.mxu0 %v5715_v3 }
  0x3a   : > { %883 = vmatpush1.bf16.msra.mxu0 %v4863_v48 }
  0x3b   : > { %884 = vmatprep.subr.bf16.mxu0 %v4868_v49 }
  0x3e   : > { %885 = vmatpush1.bf16.msra.mxu0 %v4877_v50 }
  0x3f   : > { %1215 = vmatprep.subr.bf16.mxu0 %v4734_v14 }
  0x40   : > { %3731 = vmatmul.mubr.msk.bf16.vlgmr.msra.gmra.mrb[16].mxu1 %vm358_vm0, %v4726_v12 }
  0x41   : > { %914 = vmatpush1.bf16.msra.mxu1 %v4885_v53  ;;  %538 = vmatprep.mubr.bf16.mxu1 %v5715_v3 }
  0x42   : > { %915 = vmatprep.subr.bf16.mxu1 %v4891_v54  ;;  %903 = vmatmul.mubr.bf16.vlgmr.msra.gmra.mrb[0].mxu0 %v4894_v55 }
  0x43   : > { %1216 = vmatpush1.bf16.msra.mxu0 %v4739_v15  ;;  %1247 = vmatprep.mubr.bf16.mxu0 %v5715_v3 }
  0x44   : > { %1217 = vmatprep.subr.bf16.mxu0 %v4757_v20 }
  0x45   : > { %916 = vmatpush1.bf16.msra.mxu1 %v4899_v56 }
  0x46   : > { %917 = vmatprep.subr.bf16.mxu1 %v4907_v57 }
  0x47   : > { %1218 = vmatpush1.bf16.msra.mxu0 %v4766_v23 }
  0x48   : > { %3732 = vmatmul.mubr.msk.bf16.gmra.mrb[20].mxu1 %vm358_vm0, %v4777_v26  ;;  %1219 = vmatprep.subr.bf16.mxu0 %v4773_v24 }
  0x49   : > { %548 = vmatprep.mubr.bf16.mxu1 %v5715_v3  ;;  %918 = vmatpush1.bf16.msra.mxu1 %v4916_v58 }
  0x4a   : > { %919 = vmatprep.subr.bf16.mxu1 %v4923_v59 }
  0x4b   : > { %1220 = vmatpush1.bf16.msra.mxu0 %v4783_v27 }
  0x4c   : > { %1221 = vmatprep.subr.bf16.mxu0 %v4789_v28 }
  0x4d   : > { %920 = vmatpush1.bf16.msra.mxu1 %v4931_v60 }
  0x4e   : > { %921 = vmatprep.subr.bf16.mxu1 %v4939_v61 }
  0x4f   : > { %1222 = vmatpush1.bf16.msra.mxu0 %v4810_v34 }
  0x50   : > { %3733 = vmatmul.mubr.msk.bf16.gmra.mrb[24].mxu1 %vm358_vm0, %v4821_v37  ;;  %1223 = vmatprep.subr.bf16.mxu0 %v4817_v35 }
  0x51   : > { %558 = vmatprep.mubr.bf16.mxu1 %v5715_v3  ;;  %922 = vmatpush1.bf16.msra.mxu1 %v4951_v62 }
  0x52   : > { %923 = vmatprep.subr.bf16.mxu1 %v4957_v63 }
  0x53   : > { %1224 = vmatpush1.bf16.msra.mxu0 %v4827_v38 }
  0x54   : > { %1225 = vmatprep.subr.bf16.mxu0 %v4835_v41 }
  0x55   : > { %924 = vmatpush1.bf16.msra.mxu1 %v4968_v0 }
  0x56   : > { %925 = vmatprep.subr.bf16.mxu1 %v4974_v1 }
  0x57   : > { %1226 = vmatpush1.bf16.msra.mxu0 %v4849_v44 }
  0x58   : > { %3734 = vmatmul.mubr.msk.bf16.gmra.mrb[28].mxu1 %vm358_vm0, %v283_v47  ;;  %1227 = vmatprep.subr.bf16.mxu0 %v4855_v45 }
  0x59   : > { %568 = vmatprep.mubr.bf16.mxu1 %v5715_v3  ;;  %926 = vmatpush1.bf16.msra.mxu1 %v4982_v2 }
  0x5a   : > { %927 = vmatprep.subr.bf16.mxu1 %v4988_v4 }
  0x5b   : > { %1228 = vmatpush1.bf16.msra.mxu0 %v4863_v48 }
  0x5c   : > { %1229 = vmatprep.subr.bf16.mxu0 %v4868_v49 }
  0x5d   : > { %928 = vmatpush1.bf16.msra.mxu1 %v4998_v5 }
  0x5e   : > { %1258 = vmatprep.subr.bf16.mxu1 %v4794_v29 }
  0x5f   : > { %1230 = vmatpush1.bf16.msra.mxu0 %v4877_v50 }
  0x60   : > { %3735 = vmatmul.mubr.msk.bf16.gmra.mrb[32].mxu1 %vm358_vm0, %v4724_v11  ;;  %1560 = vmatprep.subr.bf16.mxu0 %v4734_v14 }
  0x61   : > { %578 = vmatprep.mubr.bf16.mxu1 %v5715_v3 }
  0x68   : > { %3736 = vmatmul.mubr.msk.bf16.gmra.mrb[36].mxu1 %vm358_vm0, %v4775_v25 }
  0x69   : > { %588 = vmatprep.mubr.bf16.mxu1 %v5715_v3 }
  0x70   : > { %3737 = vmatmul.mubr.msk.bf16.gmra.mrb[40].mxu1 %vm358_vm0, %v4819_v36  ;;  %v299_v36 = vshrl.u32 %v298_v33, 7 }
  0x71   : > { %598 = vmatprep.mubr.bf16.mxu1 %v5715_v3 }
  0x72   : > { %v300_v37 = vsub.s32 0, %v299_v36  ;;  %v304_v40 = vsub.s32 1, %v299_v36 }
  0x74   : > { %v5072_v42 = vrot.slane %v296_v39, %v300_v37  ;;  %v5074_v43 = vrot.slane %v296_v39, %v304_v40 }
  0x78   : > { %3738 = vmatmul.mubr.msk.bf16.gmra.mrb[44].mxu1 %vm358_vm0, %v4857_v46 }
  0x79   : > { %945 = vmatprep.mubr.bf16.mxu1 %v5715_v3 }
  0x80   : > { %946 = vmatmul.mubr.bf16.vlgmr.msra.gmra.mrb[16].mxu1 %v4894_v55 }
  0x81   : > { %1259 = vmatpush1.bf16.msra.mxu1 %v4885_v53  ;;  %1290 = vmatprep.mubr.bf16.mxu1 %v5715_v3 }
  0x82   : > { %1260 = vmatprep.subr.bf16.mxu1 %v4891_v54 }
  0x85   : > { %1261 = vmatpush1.bf16.msra.mxu1 %v4899_v56 }
  0x86   : > { %1262 = vmatprep.subr.bf16.mxu1 %v4907_v57 }
  0x89   : > { %1263 = vmatpush1.bf16.msra.mxu1 %v4916_v58 }
  0x8a   : > { %1264 = vmatprep.subr.bf16.mxu1 %v4923_v59 }
  0x8d   : > { %1265 = vmatpush1.bf16.msra.mxu1 %v4931_v60 }
  0x8e   : > { %1266 = vmatprep.subr.bf16.mxu1 %v4939_v61 }
  0x91   : > { %1267 = vmatpush1.bf16.msra.mxu1 %v4951_v62 }
  0x92   : > { %1268 = vmatprep.subr.bf16.mxu1 %v4957_v63 }
  0x95   : > { %1269 = vmatpush1.bf16.msra.mxu1 %v4968_v0 }
  0x96   : > { %1270 = vmatprep.subr.bf16.mxu1 %v4974_v1 }
  0x99   : > { %1271 = vmatpush1.bf16.msra.mxu1 %v4982_v2 }
  0x9a   : > { %1272 = vmatprep.subr.bf16.mxu1 %v4988_v4 }
  0x9d   : > { %1273 = vmatpush1.bf16.msra.mxu1 %v4998_v5 }
  0x9e   : > { %1603 = vmatprep.subr.bf16.mxu1 %v4794_v29 }
  0xf3   : > { %v5037_v6 = vpop.f32.mrb[0].mxu1 }
  0xf4   : > { %v5039_v7 = vpop.f32.mrb[1].mxu1 }
  0xf5   : > { %v5041_v8 = vpop.f32.mrb[2].mxu1 }
  0xf6   : > { %v5043_v9 = vpop.f32.mrb[3].mxu1 }
  0xfb   : > { %v5045_v10 = vpop.f32.mrb[4].mxu1 }
  0xfc   : > { %v5047_v11 = vpop.f32.mrb[5].mxu1 }
  0xfd   : > { %v5049_v12 = vpop.f32.mrb[6].mxu1 }
  0xfe   : > { %5720 = vst [vmem:[#allocation6_spill] sm:$0xff] %v5049_v12  ;;  %v5051_v13 = vpop.f32.mrb[7].mxu1 }
  0xff   : > { %5721 = vst [vmem:[#allocation7_spill] sm:$0xff] %v5051_v13 }
 0x103   : > { %v5053_v14 = vpop.f32.mrb[8].mxu1 }
 0x104   : > { %5722 = vst [vmem:[#allocation8_spill] sm:$0xff] %v5053_v14  ;;  %v5055_v16 = vpop.f32.mrb[9].mxu1 }
 0x105   : > { %5723 = vst [vmem:[#allocation9_spill] sm:$0xff] %v5055_v16  ;;  %v5057_v17 = vpop.f32.mrb[10].mxu1 }
 0x106   : > { %5724 = vst [vmem:[#allocation10_spill] sm:$0xff] %v5057_v17  ;;  %v5059_v18 = vpop.f32.mrb[11].mxu1 }
 0x107   : > { %5725 = vst [vmem:[#allocation11_spill] sm:$0xff] %v5059_v18 }
 0x10b   : > { %v5061_v19 = vpop.f32.mrb[12].mxu1 }
 0x10c   : > { %5726 = vst [vmem:[#allocation12_spill] sm:$0xff] %v5061_v19  ;;  %v5063_v21 = vpop.f32.mrb[13].mxu1 }
 0x10d   : > { %5727 = vst [vmem:[#allocation13_spill] sm:$0xff] %v5063_v21  ;;  %v5065_v22 = vpop.f32.mrb[14].mxu1  ;;  %v312_v21 = vsub.s32 3, %v299_v36 }
 0x10e   : > { %5728 = vst [vmem:[#allocation14_spill] sm:$0xff] %v5065_v22  ;;  %v5067_v25 = vpop.f32.mrb[15].mxu1  ;;  %v308_v22 = vsub.s32 2, %v299_v36 }
 0x10f   : > { %5729 = vst [vmem:[#allocation15_spill] sm:$0xff] %v5067_v25 }
 0x110   : > { %v5080_v17 = vrot.slane %v296_v39, %v308_v22 }
 0x115   : > { %v904_v26 = vpop.f32.mrb[0].mxu0 }
 0x116   : > { %v906_v30 = vpop.f32.mrb[1].mxu0  ;;  %v4106_v46 = vadd.f32 %v904_v26, %v5072_v42 }
 0x117   : > { %v908_v31 = vpop.f32.mrb[2].mxu0  ;;  %v4107_v47 = vadd.f32 %v906_v30, %v5074_v43 }
 0x118   : > { %v910_v32 = vpop.f32.mrb[3].mxu0  ;;  %v4108_v51 = vadd.f32 %v908_v31, %v5072_v42  ;;  %v3771_v55 = vmul.f32 -1.442695, %v4106_v46 }
 0x119   : > { %v4109_v52 = vadd.f32 %v910_v32, %v5074_v43  ;;  %v3772_v33 = vmul.f32 -1.442695, %v4107_v47  ;;  %v5082_v32 = vrot.slane %v296_v39, %v312_v21 }
 0x11a   : > { %v3774_v3 = vmul.f32 -1.442695, %v4108_v51  ;;  %4384 = vpow2.f32 %v3771_v55 }
 0x11b   : > { %v3775_v25 = vmul.f32 -1.442695, %v4109_v52  ;;  %4386 = vpow2.f32 %v3772_v33 }
 0x11c   : > { %4388 = vpow2.f32 %v3774_v3 }
 0x11d   : > { %4390 = vpow2.f32 %v3775_v25 }
 0x124   : > { %v4385_v37 = vpop.eup %4384 }
 0x125   : > { %v4387_v40 = vpop.eup %4386  ;;  %v990_v18 = vadd.f32 1.0, %v4385_v37  ;;  %v675_v37 = vld [vmem:[#allocation5] sm:$0xff] }
 0x126   : > { %v4389_v19 = vpop.eup %4388  ;;  %v991_v30 = vadd.f32 1.0, %v4387_v40 }
 0x127   : > { %v4391_v26 = vpop.eup %4390  ;;  %v993_v31 = vadd.f32 1.0, %v4389_v19  ;;  %4392 = vrcp.f32 %v990_v18 }
 0x128   : > { %v994_v46 = vadd.f32 1.0, %v4391_v26  ;;  %4394 = vrcp.f32 %v991_v30  ;;  %v676_v30 = vld [vmem:[#allocation5 + $0x8] sm:$0xff] }
 0x129   : > { %4396 = vrcp.f32 %v993_v31 }
 0x12a   : > { %4398 = vrcp.f32 %v994_v46 }
 0x131   : > { %v4393_v18 = vpop.eup %4392 }
 0x132   : > { %v4395_v39 = vpop.eup %4394  ;;  %v1012_v46 = vmul.f32 %v4393_v18, %v675_v37 }
 0x133   : > { %v4397_v33 = vpop.eup %4396 }
 0x134   : > { %v4399_v40 = vpop.eup %4398 }
 0x153   : > { %v947_v47 = vpop.f32.mrb[16].mxu1 }
 0x154   : > { %v4154_v3 = vadd.f32 %v947_v47, %v5080_v17  ;;  %v949_v25 = vpop.f32.mrb[17].mxu1 }
 0x155   : > { %v4155_v51 = vadd.f32 %v949_v25, %v5082_v32  ;;  %v951_v36 = vpop.f32.mrb[18].mxu1 }
 0x156   : > { %v3773_v52 = vmul.f32 -1.442695, %v4154_v3  ;;  %v4156_v55 = vadd.f32 %v951_v36, %v5080_v17  ;;  %v953_v22 = vpop.f32.mrb[19].mxu1 }
 0x157   : > { %4400 = vtanh.f32 %v4155_v51  ;;  %v4157_v19 = vadd.f32 %v953_v22, %v5082_v32  ;;  %v1013_v51 = vmul.f32 %v4397_v33, %v676_v30  ;;  %v5731_v33 = vmov 0  }
 0x158   : > { %4402 = vpow2.f32 %v3773_v52  ;;  %v3776_v21 = vmul.f32 -1.442695, %v4156_v55 }
 0x159   : > { %4404 = vtanh.f32 %v4157_v19 }
 0x15a   : > { %4406 = vpow2.f32 %v3776_v21 }
 0x161   : > { %v4401_v26 = vpop.eup %4400 }
 0x162   : > { %v4403_v31 = vpop.eup %4402  ;;  %v1010_v47 = vmul.f32 %v4401_v26, %v4395_v39 }
 0x163   : > { %v4405_v3 = vpop.eup %4404  ;;  %v992_v25 = vadd.f32 1.0, %v4403_v31 }
 0x164   : > { %v4407_v36 = vpop.eup %4406  ;;  %v5088_v16 = vadd.f32 %v1012_v46, %v1010_v47  ;;  %v1011_v52 = vmul.f32 %v4405_v3, %v4399_v40 }
 0x165   : > { %4408 = vrcp.f32 %v992_v25  ;;  %v995_v55 = vadd.f32 1.0, %v4407_v36 }
 0x166   : > { %4410 = vtanh.f32 %v5088_v16  ;;  %v5091_v22 = vadd.f32 %v1013_v51, %v1011_v52 }
 0x167   : > { %4412 = vrcp.f32 %v995_v55 }
 0x168   : > { %4414 = vtanh.f32 %v5091_v22 }
 0x16f   : > { %v4409_v19 = vpop.eup %4408 }
 0x170   : > { %v4411_v21 = vpop.eup %4410 }
 0x171   : > { %v4413_v18 = vpop.eup %4412  ;;  %v1018_v37 = vmul.f32 %v4411_v21, %v4409_v19 }
 0x172   : > { %v4415_v39 = vpop.eup %4414 }
 0x173   : > { %v1019_v26 = vmul.f32 %v4415_v39, %v4413_v18 }
 0x175   : > { %v5094_v31 = vpack.c.bf16 %v1019_v26, %v1018_v37 }
 0x177   : > { %5730 = vst [vmem:[#allocation16_spill] sm:$0xff] %v5094_v31  ;;  %1248 = vmatmul.mubr.bf16.vlgmr.msra.gmra.mrb[4].mxu0 %v5094_v31  ;;  %1291 = vmatmul.mubr.bf16.vlgmr.msra.gmra.mrb[20].mxu1 %v5094_v31 }
 0x178   : > { %1561 = vmatpush1.bf16.msra.mxu0 %v4739_v15  ;;  %1604 = vmatpush1.bf16.msra.mxu1 %v4885_v53 }
 0x179   : > { %1562 = vmatprep.subr.bf16.mxu0 %v4757_v20  ;;  %1605 = vmatprep.subr.bf16.mxu1 %v4891_v54 }
 0x17a   : > { %1592 = vmatprep.mubr.bf16.mxu0 %v5731_v33  ;;  %1635 = vmatprep.mubr.bf16.mxu1 %v5731_v33 }
 0x17c   : > { %1563 = vmatpush1.bf16.msra.mxu0 %v4766_v23  ;;  %1606 = vmatpush1.bf16.msra.mxu1 %v4899_v56 }
 0x17d   : > { %1564 = vmatprep.subr.bf16.mxu0 %v4773_v24  ;;  %1607 = vmatprep.subr.bf16.mxu1 %v4907_v57 }
 0x180   : > { %1565 = vmatpush1.bf16.msra.mxu0 %v4783_v27  ;;  %1608 = vmatpush1.bf16.msra.mxu1 %v4916_v58 }
 0x181   : > { %1566 = vmatprep.subr.bf16.mxu0 %v4789_v28  ;;  %1609 = vmatprep.subr.bf16.mxu1 %v4923_v59 }
 0x184   : > { %1567 = vmatpush1.bf16.msra.mxu0 %v4810_v34  ;;  %1610 = vmatpush1.bf16.msra.mxu1 %v4931_v60 }
 0x185   : > { %1568 = vmatprep.subr.bf16.mxu0 %v4817_v35  ;;  %1611 = vmatprep.subr.bf16.mxu1 %v4939_v61 }
 0x188   : > { %1569 = vmatpush1.bf16.msra.mxu0 %v4827_v38  ;;  %1612 = vmatpush1.bf16.msra.mxu1 %v4951_v62 }
 0x189   : > { %1570 = vmatprep.subr.bf16.mxu0 %v4835_v41  ;;  %1613 = vmatprep.subr.bf16.mxu1 %v4957_v63 }
 0x18c   : > { %1571 = vmatpush1.bf16.msra.mxu0 %v4849_v44  ;;  %1614 = vmatpush1.bf16.msra.mxu1 %v4968_v0 }
 0x18d   : > { %1572 = vmatprep.subr.bf16.mxu0 %v4855_v45  ;;  %1615 = vmatprep.subr.bf16.mxu1 %v4974_v1 }
 0x190   : > { %1573 = vmatpush1.bf16.msra.mxu0 %v4863_v48  ;;  %1616 = vmatpush1.bf16.msra.mxu1 %v4982_v2 }
 0x191   : > { %1574 = vmatprep.subr.bf16.mxu0 %v4868_v49  ;;  %1617 = vmatprep.subr.bf16.mxu1 %v4988_v4 }
 0x194   : > { %1575 = vmatpush1.bf16.msra.mxu0 %v4877_v50  ;;  %1618 = vmatpush1.bf16.msra.mxu1 %v4998_v5 }
 0x195   : > { %1948 = vmatprep.subr.bf16.mxu1 %v4794_v29 }
 0x24a   : > { %v1249_v15 = vpop.f32.mrb[4].mxu0  ;;  %v1292_v20 = vpop.f32.mrb[20].mxu1 }
 0x24b   : > { %v4110_v23 = vadd.f32 %v1249_v15, %v5072_v42  ;;  %v1251_v24 = vpop.f32.mrb[5].mxu0  ;;  %v1294_v27 = vpop.f32.mrb[21].mxu1  ;;  %v4158_v40 = vadd.f32 %v1292_v20, %v5080_v17 }
 0x24c   : > { %v4111_v28 = vadd.f32 %v1251_v24, %v5074_v43  ;;  %v1253_v34 = vpop.f32.mrb[6].mxu0  ;;  %v1296_v35 = vpop.f32.mrb[22].mxu1  ;;  %v4159_v46 = vadd.f32 %v1294_v27, %v5082_v32 }
 0x24d   : > { %v3809_v38 = vmul.f32 -1.442695, %v4110_v23  ;;  %v4112_v41 = vadd.f32 %v1253_v34, %v5072_v42  ;;  %v1255_v44 = vpop.f32.mrb[7].mxu0  ;;  %v1298_v45 = vpop.f32.mrb[23].mxu1  ;;  %v4160_v30 = vadd.f32 %v1296_v35, %v5080_v17  ;;  %v3811_v47 = vmul.f32 -1.442695, %v4158_v40 }
 0x24e   : > { %v3810_v48 = vmul.f32 -1.442695, %v4111_v28  ;;  %v4113_v49 = vadd.f32 %v1255_v44, %v5074_v43  ;;  %v4161_v19 = vadd.f32 %v1298_v45, %v5082_v32 }
 0x24f   : > { %4416 = vpow2.f32 %v3809_v38  ;;  %v3812_v29 = vmul.f32 -1.442695, %v4112_v41  ;;  %v3814_v25 = vmul.f32 -1.442695, %v4160_v30 }
 0x250   : > { %v3813_v50 = vmul.f32 -1.442695, %v4113_v49  ;;  %4418 = vpow2.f32 %v3810_v48 }
 0x251   : > { %4420 = vpow2.f32 %v3812_v29 }
 0x252   : > { %4422 = vpow2.f32 %v3813_v50 }
 0x253   : > { %4424 = vtanh.f32 %v4159_v46 }
 0x254   : > { %4426 = vpow2.f32 %v3811_v47  ;;  %v5260_v47 = vld [vmem:[%s5711_s3 + $0xe0] ss:$16 sps:$4 sm:$0xff]  }
 0x259   : > { %v4417_v3 = vpop.eup %4416 }
 0x25a   : > { %v1335_v36 = vadd.f32 1.0, %v4417_v3  ;;  %v4419_v51 = vpop.eup %4418 }
 0x25b   : > { %v4421_v52 = vpop.eup %4420  ;;  %v1336_v55 = vadd.f32 1.0, %v4419_v51 }
 0x25c   : > { %4428 = vrcp.f32 %v1335_v36  ;;  %v1338_v21 = vadd.f32 1.0, %v4421_v52  ;;  %v4423_v18 = vpop.eup %4422 }
 0x25d   : > { %4430 = vpow2.f32 %v3814_v25  ;;  %v1339_v39 = vadd.f32 1.0, %v4423_v18  ;;  %v4425_v37 = vpop.eup %4424 }
 0x25e   : > { %4432 = vrcp.f32 %v1336_v55  ;;  %v4427_v26 = vpop.eup %4426 }
 0x25f   : > { %4434 = vrcp.f32 %v1338_v21  ;;  %v1337_v28 = vadd.f32 1.0, %v4427_v26 }
 0x260   : > { %4436 = vtanh.f32 %v4161_v19 }
 0x261   : > { %4438 = vrcp.f32 %v1339_v39 }
 0x262   : > { %4440 = vrcp.f32 %v1337_v28 }
 0x266   : > { %v4429_v15 = vpop.eup %4428 }
 0x267   : > { %v4431_v20 = vpop.eup %4430  ;;  %v1357_v23 = vmul.f32 %v4429_v15, %v5088_v16 }
 0x268   : > { %v4433_v24 = vpop.eup %4432  ;;  %v1340_v45 = vadd.f32 1.0, %v4431_v20 }
 0x269   : > { %v4435_v27 = vpop.eup %4434  ;;  %v1355_v34 = vmul.f32 %v4433_v24, %v4425_v37 }
 0x26a   : > { %v4437_v35 = vpop.eup %4436  ;;  %v1358_v38 = vmul.f32 %v4435_v27, %v5091_v22 }
 0x26b   : > { %v4439_v41 = vpop.eup %4438  ;;  %v5141_v44 = vadd.f32 %v1357_v23, %v1355_v34 }
 0x26c   : > { %v1356_v48 = vmul.f32 %v4439_v41, %v4437_v35  ;;  %v4441_v16 = vpop.eup %4440 }
 0x26d   : > { %4442 = vtanh.f32 %v5141_v44 }
 0x26e   : > { %v5144_v49 = vadd.f32 %v1358_v38, %v1356_v48  ;;  %4444 = vrcp.f32 %v1340_v45 }
 0x270   : > { %4446 = vtanh.f32 %v5144_v49 }
 0x277   : > { %v4443_v29 = vpop.eup %4442 }
 0x278   : > { %v4445_v50 = vpop.eup %4444  ;;  %v1363_v30 = vmul.f32 %v4443_v29, %v4441_v16 }
 0x27a   : > { %v4447_v40 = vpop.eup %4446 }
 0x27b   : > { %v1364_v46 = vmul.f32 %v4447_v40, %v4445_v50 }
 0x27d   : > { %v5147_v22 = vpack.c.bf16 %v1364_v46, %v1363_v30 }
 0x27f   : > { %5732 = vst [vmem:[#allocation17_spill] sm:$0xff] %v5147_v22  ;;  %1593 = vmatmul.mubr.bf16.vlgmr.msra.gmra.mrb[8].mxu0 %v5147_v22  ;;  %1636 = vmatmul.mubr.bf16.vlgmr.msra.gmra.mrb[24].mxu1 %v5147_v22 }
 0x280   : > { %1949 = vmatpush1.bf16.msra.mxu1 %v4885_v53  ;;  %1937 = vmatprep.mubr.bf16.mxu0 %v5731_v33  ;;  %v5171_v53 = vld [vmem:[%s5711_s3 + $0x4] ss:$16 sps:$4 sm:$0xff]  }
 0x281   : > { %1950 = vmatprep.subr.bf16.mxu1 %v4891_v54  ;;  %1980 = vmatprep.mubr.bf16.mxu1 %v5731_v33  ;;  %v5176_v54 = vld [vmem:[%s5711_s3] ss:$16 sps:$4 sm:$0xff]  }
 0x282   : > { %1905 = vmatprep.subr.bf16.mxu0 %v5171_v53 }
 0x283   : > { %1906 = vmatpush1.bf16.msra.mxu0 %v5176_v54 }
 0x284   : > { %1951 = vmatpush1.bf16.msra.mxu1 %v4899_v56  ;;  %v5183_v56 = vld [vmem:[%s5711_s3 + $0x24] ss:$16 sps:$4 sm:$0xff]  }
 0x285   : > { %1952 = vmatprep.subr.bf16.mxu1 %v4907_v57  ;;  %v5188_v57 = vld [vmem:[%s5711_s3 + $0x20] ss:$16 sps:$4 sm:$0xff]   ;;  %1907 = vmatprep.subr.bf16.mxu0 %v5183_v56 }
 0x287   : > { %1908 = vmatpush1.bf16.msra.mxu0 %v5188_v57 }
 0x288   : > { %1953 = vmatpush1.bf16.msra.mxu1 %v4916_v58  ;;  %v5195_v58 = vld [vmem:[%s5711_s3 + $0x44] ss:$16 sps:$4 sm:$0xff]  }
 0x289   : > { %1954 = vmatprep.subr.bf16.mxu1 %v4923_v59  ;;  %v5200_v59 = vld [vmem:[%s5711_s3 + $0x40] ss:$16 sps:$4 sm:$0xff]   ;;  %1909 = vmatprep.subr.bf16.mxu0 %v5195_v58 }
 0x28b   : > { %1910 = vmatpush1.bf16.msra.mxu0 %v5200_v59 }
 0x28c   : > { %1955 = vmatpush1.bf16.msra.mxu1 %v4931_v60  ;;  %v5207_v60 = vld [vmem:[%s5711_s3 + $0x64] ss:$16 sps:$4 sm:$0xff]  }
 0x28d   : > { %1956 = vmatprep.subr.bf16.mxu1 %v4939_v61  ;;  %v5212_v61 = vld [vmem:[%s5711_s3 + $0x60] ss:$16 sps:$4 sm:$0xff]   ;;  %1911 = vmatprep.subr.bf16.mxu0 %v5207_v60 }
 0x28f   : > { %1912 = vmatpush1.bf16.msra.mxu0 %v5212_v61 }
 0x290   : > { %1957 = vmatpush1.bf16.msra.mxu1 %v4951_v62  ;;  %v5219_v62 = vld [vmem:[%s5711_s3 + $0x80] ss:$16 sps:$4 sm:$0xff]  }
 0x291   : > { %1958 = vmatprep.subr.bf16.mxu1 %v4957_v63  ;;  %v5224_v63 = vld [vmem:[%s5711_s3 + $0x84] ss:$16 sps:$4 sm:$0xff]  }
 0x292   : > { %1913 = vmatprep.subr.bf16.mxu0 %v5224_v63 }
 0x293   : > { %1914 = vmatpush1.bf16.msra.mxu0 %v5219_v62 }
 0x294   : > { %1959 = vmatpush1.bf16.msra.mxu1 %v4968_v0  ;;  %v5229_v0 = vld [vmem:[%s5711_s3 + $0xa4] ss:$16 sps:$4 sm:$0xff]  }
 0x295   : > { %1960 = vmatprep.subr.bf16.mxu1 %v4974_v1  ;;  %v5236_v1 = vld [vmem:[%s5711_s3 + $0xa0] ss:$16 sps:$4 sm:$0xff]   ;;  %1915 = vmatprep.subr.bf16.mxu0 %v5229_v0 }
 0x297   : > { %1916 = vmatpush1.bf16.msra.mxu0 %v5236_v1 }
 0x298   : > { %1961 = vmatpush1.bf16.msra.mxu1 %v4982_v2  ;;  %v5242_v2 = vld [vmem:[%s5711_s3 + $0xc4] ss:$16 sps:$4 sm:$0xff]  }
 0x299   : > { %1962 = vmatprep.subr.bf16.mxu1 %v4988_v4  ;;  %v5248_v4 = vld [vmem:[%s5711_s3 + $0xc0] ss:$16 sps:$4 sm:$0xff]   ;;  %1917 = vmatprep.subr.bf16.mxu0 %v5242_v2 }
 0x29b   : > { %1918 = vmatpush1.bf16.msra.mxu0 %v5248_v4 }
 0x29c   : > { %1963 = vmatpush1.bf16.msra.mxu1 %v4998_v5  ;;  %v5254_v5 = vld [vmem:[%s5711_s3 + $0xe4] ss:$16 sps:$4 sm:$0xff]  }
 0x29d   : > { %1919 = vmatprep.subr.bf16.mxu0 %v5254_v5 }
 0x29f   : > { %1920 = vmatpush1.bf16.msra.mxu0 %v5260_v47 }
 0x2a0   : > { %2250 = vmatprep.subr.bf16.mxu0 %v5171_v53 }
 0x352   : > { %v1594_v3 = vpop.f32.mrb[8].mxu0  ;;  %v1637_v25 = vpop.f32.mrb[24].mxu1 }
 0x353   : > { %v4114_v36 = vadd.f32 %v1594_v3, %v5072_v42  ;;  %v1596_v51 = vpop.f32.mrb[9].mxu0  ;;  %v1639_v52 = vpop.f32.mrb[25].mxu1  ;;  %v4162_v27 = vadd.f32 %v1637_v25, %v5080_v17 }
 0x354   : > { %v4115_v55 = vadd.f32 %v1596_v51, %v5074_v43  ;;  %v1598_v19 = vpop.f32.mrb[10].mxu0  ;;  %v1641_v21 = vpop.f32.mrb[26].mxu1  ;;  %v4163_v34 = vadd.f32 %v1639_v52, %v5082_v32 }
 0x355   : > { %v3847_v18 = vmul.f32 -1.442695, %v4114_v36  ;;  %v4116_v39 = vadd.f32 %v1598_v19, %v5072_v42  ;;  %v1600_v37 = vpop.f32.mrb[11].mxu0  ;;  %v1643_v26 = vpop.f32.mrb[27].mxu1  ;;  %v4164_v28 = vadd.f32 %v1641_v21, %v5080_v17  ;;  %v3849_v35 = vmul.f32 -1.442695, %v4162_v27 }
 0x356   : > { %v3848_v15 = vmul.f32 -1.442695, %v4115_v55  ;;  %v4117_v20 = vadd.f32 %v1600_v37, %v5074_v43  ;;  %v4165_v50 = vadd.f32 %v1643_v26, %v5082_v32 }
 0x357   : > { %4448 = vpow2.f32 %v3847_v18  ;;  %v3850_v23 = vmul.f32 -1.442695, %v4116_v39  ;;  %v3852_v41 = vmul.f32 -1.442695, %v4164_v28 }
 0x358   : > { %v3851_v24 = vmul.f32 -1.442695, %v4117_v20  ;;  %4450 = vpow2.f32 %v3848_v15 }
 0x359   : > { %4452 = vpow2.f32 %v3850_v23 }
 0x35a   : > { %4454 = vpow2.f32 %v3851_v24 }
 0x35b   : > { %4456 = vtanh.f32 %v4163_v34 }
 0x35c   : > { %4458 = vpow2.f32 %v3849_v35 }
 0x361   : > { %v4449_v38 = vpop.eup %4448 }
 0x362   : > { %v1680_v45 = vadd.f32 1.0, %v4449_v38  ;;  %v4451_v48 = vpop.eup %4450 }
 0x363   : > { %v4453_v16 = vpop.eup %4452  ;;  %v1681_v29 = vadd.f32 1.0, %v4451_v48  ;;  %v5318_v48 = vld [vmem:[%s5711_s3 + $0x2c] ss:$16 sps:$4 sm:$0xff]  }
 0x364   : > { %4460 = vrcp.f32 %v1680_v45  ;;  %v1683_v40 = vadd.f32 1.0, %v4453_v16  ;;  %v4455_v30 = vpop.eup %4454  ;;  %v5311_v45 = vld [vmem:[%s5711_s3 + $0x8] ss:$16 sps:$4 sm:$0xff]  }
 0x365   : > { %4462 = vpow2.f32 %v3852_v41  ;;  %v1684_v46 = vadd.f32 1.0, %v4455_v30  ;;  %v4457_v3 = vpop.eup %4456  ;;  %v5306_v41 = vld [vmem:[%s5711_s3 + $0xc] ss:$16 sps:$4 sm:$0xff]   ;;  %v5323_v16 = vld [vmem:[%s5711_s3 + $0x28] ss:$16 sps:$4 sm:$0xff]  }
 0x366   : > { %4464 = vrcp.f32 %v1681_v29  ;;  %v4459_v25 = vpop.eup %4458  ;;  %2293 = vmatprep.subr.bf16.mxu1 %v5306_v41  ;;  %v5330_v29 = vld [vmem:[%s5711_s3 + $0x4c] ss:$16 sps:$4 sm:$0xff]   ;;  %v5347_v30 = vld [vmem:[%s5711_s3 + $0x68] ss:$16 sps:$4 sm:$0xff]  }
 0x367   : > { %4466 = vrcp.f32 %v1683_v40  ;;  %v1682_v21 = vadd.f32 1.0, %v4459_v25  ;;  %v5342_v40 = vld [vmem:[%s5711_s3 + $0x6c] ss:$16 sps:$4 sm:$0xff]  }
 0x368   : > { %4468 = vtanh.f32 %v4165_v50  ;;  %v5335_v50 = vld [vmem:[%s5711_s3 + $0x48] ss:$16 sps:$4 sm:$0xff]   ;;  %v5364_v25 = vld [vmem:[%s5711_s3 + $0xac] ss:$16 sps:$4 sm:$0xff]  }
 0x369   : > { %4470 = vrcp.f32 %v1684_v46  ;;  %v5354_v46 = vld [vmem:[%s5711_s3 + $0x88] ss:$16 sps:$4 sm:$0xff]  }
 0x36a   : > { %4472 = vrcp.f32 %v1682_v21 }
 0x36e   : > { %v4461_v36 = vpop.eup %4460 }
 0x36f   : > { %v4463_v51 = vpop.eup %4462  ;;  %v1702_v52 = vmul.f32 %v4461_v36, %v5141_v44  ;;  %v5371_v36 = vld [vmem:[%s5711_s3 + $0xa8] ss:$16 sps:$4 sm:$0xff]  }
 0x370   : > { %v4465_v55 = vpop.eup %4464  ;;  %v1685_v20 = vadd.f32 1.0, %v4463_v51  ;;  %v5377_v51 = vld [vmem:[%s5711_s3 + $0xcc] ss:$16 sps:$4 sm:$0xff]  }
 0x371   : > { %v4467_v19 = vpop.eup %4466  ;;  %v1700_v18 = vmul.f32 %v4465_v55, %v4457_v3  ;;  %v5359_v3 = vld [vmem:[%s5711_s3 + $0x8c] ss:$16 sps:$4 sm:$0xff]  }
 0x372   : > { %v4469_v39 = vpop.eup %4468  ;;  %v1703_v37 = vmul.f32 %v4467_v19, %v5144_v49  ;;  %v5389_v55 = vld [vmem:[%s5711_s3 + $0xec] ss:$16 sps:$4 sm:$0xff]   ;;  %v5395_v19 = vld [vmem:[%s5711_s3 + $0xe8] ss:$16 sps:$4 sm:$0xff]  }
 0x373   : > { %v4471_v26 = vpop.eup %4470  ;;  %v5275_v15 = vadd.f32 %v1702_v52, %v1700_v18  ;;  %v5383_v52 = vld [vmem:[%s5711_s3 + $0xc8] ss:$16 sps:$4 sm:$0xff]  }
 0x374   : > { %v1701_v23 = vmul.f32 %v4471_v26, %v4469_v39  ;;  %v4473_v44 = vpop.eup %4472 }
 0x375   : > { %4474 = vtanh.f32 %v5275_v15 }
 0x376   : > { %v5278_v24 = vadd.f32 %v1703_v37, %v1701_v23  ;;  %4476 = vrcp.f32 %v1685_v20 }
 0x378   : > { %4478 = vtanh.f32 %v5278_v24 }
 0x37f   : > { %v4475_v27 = vpop.eup %4474 }
 0x380   : > { %v4477_v28 = vpop.eup %4476  ;;  %v1708_v35 = vmul.f32 %v4475_v27, %v4473_v44 }
 0x382   : > { %v4479_v34 = vpop.eup %4478 }
 0x383   : > { %v1709_v38 = vmul.f32 %v4479_v34, %v4477_v28 }
 0x385   : > { %v5281_v49 = vpack.c.bf16 %v1709_v38, %v1708_v35 }
 0x387   : > { %5733 = vst [vmem:[#allocation18_spill] sm:$0xff] %v5281_v49  ;;  %1938 = vmatmul.mubr.bf16.vlgmr.msra.gmra.mrb[12].mxu0 %v5281_v49  ;;  %1981 = vmatmul.mubr.bf16.vlgmr.msra.gmra.mrb[28].mxu1 %v5281_v49 }
 0x388   : > { %2251 = vmatpush1.bf16.msra.mxu0 %v5176_v54  ;;  %2282 = vmatprep.mubr.bf16.mxu0 %v5731_v33 }
 0x389   : > { %2252 = vmatprep.subr.bf16.mxu0 %v5183_v56  ;;  %2325 = vmatprep.mubr.bf16.mxu1 %v5731_v33 }
 0x38a   : > { %2294 = vmatpush1.bf16.msra.mxu1 %v5311_v45 }
 0x38b   : > { %2295 = vmatprep.subr.bf16.mxu1 %v5318_v48 }
 0x38c   : > { %2253 = vmatpush1.bf16.msra.mxu0 %v5188_v57 }
 0x38d   : > { %2254 = vmatprep.subr.bf16.mxu0 %v5195_v58 }
 0x38e   : > { %2296 = vmatpush1.bf16.msra.mxu1 %v5323_v16 }
 0x38f   : > { %2297 = vmatprep.subr.bf16.mxu1 %v5330_v29 }
 0x390   : > { %2255 = vmatpush1.bf16.msra.mxu0 %v5200_v59 }
 0x391   : > { %2256 = vmatprep.subr.bf16.mxu0 %v5207_v60 }
 0x392   : > { %2298 = vmatpush1.bf16.msra.mxu1 %v5335_v50 }
 0x393   : > { %2299 = vmatprep.subr.bf16.mxu1 %v5342_v40 }
 0x394   : > { %2257 = vmatpush1.bf16.msra.mxu0 %v5212_v61 }
 0x395   : > { %2258 = vmatprep.subr.bf16.mxu0 %v5224_v63 }
 0x396   : > { %2300 = vmatpush1.bf16.msra.mxu1 %v5347_v30 }
 0x397   : > { %2301 = vmatprep.subr.bf16.mxu1 %v5359_v3 }
 0x398   : > { %2259 = vmatpush1.bf16.msra.mxu0 %v5219_v62 }
 0x399   : > { %2260 = vmatprep.subr.bf16.mxu0 %v5229_v0 }
 0x39a   : > { %2302 = vmatpush1.bf16.msra.mxu1 %v5354_v46 }
 0x39b   : > { %2303 = vmatprep.subr.bf16.mxu1 %v5364_v25 }
 0x39c   : > { %2261 = vmatpush1.bf16.msra.mxu0 %v5236_v1 }
 0x39d   : > { %2262 = vmatprep.subr.bf16.mxu0 %v5242_v2 }
 0x39e   : > { %2304 = vmatpush1.bf16.msra.mxu1 %v5371_v36 }
 0x39f   : > { %2305 = vmatprep.subr.bf16.mxu1 %v5377_v51 }
 0x3a0   : > { %2263 = vmatpush1.bf16.msra.mxu0 %v5248_v4 }
 0x3a1   : > { %2264 = vmatprep.subr.bf16.mxu0 %v5254_v5 }
 0x3a2   : > { %2306 = vmatpush1.bf16.msra.mxu1 %v5383_v52 }
 0x3a3   : > { %2307 = vmatprep.subr.bf16.mxu1 %v5389_v55 }
 0x3a4   : > { %2265 = vmatpush1.bf16.msra.mxu0 %v5260_v47 }
 0x3a5   : > { %2595 = vmatprep.subr.bf16.mxu0 %v5171_v53 }
 0x3a6   : > { %2308 = vmatpush1.bf16.msra.mxu1 %v5395_v19 }
 0x3a7   : > { %2638 = vmatprep.subr.bf16.mxu1 %v5306_v41 }
 0x45a   : > { %v1939_v21 = vpop.f32.mrb[12].mxu0  ;;  %v1982_v18 = vpop.f32.mrb[28].mxu1 }
 0x45b   : > { %v4118_v39 = vadd.f32 %v1939_v21, %v5072_v42  ;;  %v1941_v37 = vpop.f32.mrb[13].mxu0  ;;  %v1984_v26 = vpop.f32.mrb[29].mxu1  ;;  %v4166_v21 = vadd.f32 %v1982_v18, %v5080_v17 }
 0x45c   : > { %v4119_v20 = vadd.f32 %v1941_v37, %v5074_v43  ;;  %v1943_v23 = vpop.f32.mrb[14].mxu0  ;;  %v1986_v44 = vpop.f32.mrb[30].mxu1  ;;  %v4167_v14 = vadd.f32 %v1984_v26, %v5082_v32 }
 0x45d   : > { %v3885_v27 = vmul.f32 -1.442695, %v4118_v39  ;;  %v4120_v28 = vadd.f32 %v1943_v23, %v5072_v42  ;;  %v1945_v34 = vpop.f32.mrb[15].mxu0  ;;  %v1988_v35 = vpop.f32.mrb[31].mxu1  ;;  %v4168_v37 = vadd.f32 %v1986_v44, %v5080_v17  ;;  %v3887_v39 = vmul.f32 -1.442695, %v4166_v21 }
 0x45e   : > { %v3886_v38 = vmul.f32 -1.442695, %v4119_v20  ;;  %v4121_v49 = vadd.f32 %v1945_v34, %v5074_v43 }
 0x45f   : > { %4480 = vpow2.f32 %v3885_v27  ;;  %v3888_v22 = vmul.f32 -1.442695, %v4120_v28  ;;  %v3890_v23 = vmul.f32 -1.442695, %v4168_v37 }
 0x460   : > { %v3889_v31 = vmul.f32 -1.442695, %v4121_v49  ;;  %4482 = vpow2.f32 %v3886_v38  ;;  %v4169_v49 = vadd.f32 %v1988_v35, %v5082_v32 }
 0x461   : > { %4484 = vpow2.f32 %v3888_v22 }
 0x462   : > { %4486 = vpow2.f32 %v3889_v31 }
 0x463   : > { %4488 = vtanh.f32 %v4167_v14 }
 0x464   : > { %4490 = vpow2.f32 %v3887_v39 }
 0x469   : > { %v4481_v13 = vpop.eup %4480 }
 0x46a   : > { %v2025_v12 = vadd.f32 1.0, %v4481_v13  ;;  %v4483_v20 = vpop.eup %4482 }
 0x46b   : > { %v4485_v34 = vpop.eup %4484  ;;  %v2026_v27 = vadd.f32 1.0, %v4483_v20 }
 0x46c   : > { %4492 = vrcp.f32 %v2025_v12  ;;  %v2028_v22 = vadd.f32 1.0, %v4485_v34  ;;  %v4487_v18 = vpop.eup %4486 }
 0x46d   : > { %4494 = vpow2.f32 %v3890_v23  ;;  %v2029_v31 = vadd.f32 1.0, %v4487_v18  ;;  %v4489_v26 = vpop.eup %4488 }
 0x46e   : > { %4496 = vrcp.f32 %v2026_v27  ;;  %v4491_v44 = vpop.eup %4490 }
 0x46f   : > { %4498 = vrcp.f32 %v2028_v22  ;;  %v2027_v12 = vadd.f32 1.0, %v4491_v44 }
 0x470   : > { %4500 = vtanh.f32 %v4169_v49 }
 0x471   : > { %4502 = vrcp.f32 %v2029_v31 }
 0x472   : > { %4504 = vrcp.f32 %v2027_v12 }
 0x476   : > { %v4493_v28 = vpop.eup %4492 }
 0x477   : > { %v4495_v13 = vpop.eup %4494  ;;  %v2047_v14 = vmul.f32 %v4493_v28, %v5275_v15  ;;  %v458_v28 = vadd.f32 %v5037_v6, %v5072_v42 }
 0x478   : > { %v4497_v38 = vpop.eup %4496  ;;  %v2030_v34 = vadd.f32 1.0, %v4495_v13  ;;  %v460_v13 = vadd.f32 %v5039_v7, %v5074_v43 }
 0x479   : > { %v4499_v21 = vpop.eup %4498  ;;  %v2045_v37 = vmul.f32 %v4497_v38, %v4489_v26 }
 0x47a   : > { %v4501_v39 = vpop.eup %4500  ;;  %v2048_v35 = vmul.f32 %v4499_v21, %v5278_v24  ;;  %v462_v21 = vadd.f32 %v5041_v8, %v5072_v42 }
 0x47b   : > { %v4503_v23 = vpop.eup %4502  ;;  %v5410_v20 = vadd.f32 %v2047_v14, %v2045_v37 }
 0x47c   : > { %v2046_v27 = vmul.f32 %v4503_v23, %v4501_v39  ;;  %v4505_v15 = vpop.eup %4504 }
 0x47d   : > { %4506 = vtanh.f32 %v5410_v20 }
 0x47e   : > { %v5413_v49 = vadd.f32 %v2048_v35, %v2046_v27  ;;  %4508 = vrcp.f32 %v2030_v34  ;;  %v464_v35 = vadd.f32 %v5043_v9, %v5074_v43 }
 0x480   : > { %4510 = vtanh.f32 %v5413_v49 }
 0x487   : > { %v4507_v22 = vpop.eup %4506 }
 0x488   : > { %v4509_v18 = vpop.eup %4508  ;;  %v2053_v26 = vmul.f32 %v4507_v22, %v4505_v15 }
 0x48a   : > { %v4511_v31 = vpop.eup %4510 }
 0x48b   : > { %v2054_v44 = vmul.f32 %v4511_v31, %v4509_v18 }
 0x48d   : > { %v5416_v24 = vpack.c.bf16 %v2054_v44, %v2053_v26 }
 0x48f   : > { %2283 = vmatmul.mubr.bf16.vlgmr.msra.gmra.mrb[16].mxu0 %v5416_v24  ;;  %2326 = vmatmul.mubr.bf16.vlgmr.msra.gmra.mrb[32].mxu1 %v5416_v24 }
 0x490   : > { %2596 = vmatpush1.bf16.msra.mxu0 %v5176_v54  ;;  %2639 = vmatpush1.bf16.msra.mxu1 %v5311_v45 }
 0x491   : > { %2597 = vmatprep.subr.bf16.mxu0 %v5183_v56  ;;  %2640 = vmatprep.subr.bf16.mxu1 %v5318_v48 }
 0x492   : > { %2627 = vmatprep.mubr.bf16.mxu0 %v5731_v33  ;;  %2670 = vmatprep.mubr.bf16.mxu1 %v5731_v33 }
 0x494   : > { %2598 = vmatpush1.bf16.msra.mxu0 %v5188_v57  ;;  %2641 = vmatpush1.bf16.msra.mxu1 %v5323_v16 }
 0x495   : > { %2599 = vmatprep.subr.bf16.mxu0 %v5195_v58  ;;  %2642 = vmatprep.subr.bf16.mxu1 %v5330_v29 }
 0x498   : > { %2600 = vmatpush1.bf16.msra.mxu0 %v5200_v59  ;;  %2643 = vmatpush1.bf16.msra.mxu1 %v5335_v50 }
 0x499   : > { %2601 = vmatprep.subr.bf16.mxu0 %v5207_v60  ;;  %2644 = vmatprep.subr.bf16.mxu1 %v5342_v40 }
 0x49c   : > { %2602 = vmatpush1.bf16.msra.mxu0 %v5212_v61  ;;  %2645 = vmatpush1.bf16.msra.mxu1 %v5347_v30 }
 0x49d   : > { %2603 = vmatprep.subr.bf16.mxu0 %v5224_v63  ;;  %2646 = vmatprep.subr.bf16.mxu1 %v5359_v3 }
 0x4a0   : > { %2604 = vmatpush1.bf16.msra.mxu0 %v5219_v62  ;;  %2647 = vmatpush1.bf16.msra.mxu1 %v5354_v46 }
 0x4a1   : > { %2605 = vmatprep.subr.bf16.mxu0 %v5229_v0  ;;  %2648 = vmatprep.subr.bf16.mxu1 %v5364_v25 }
 0x4a4   : > { %2606 = vmatpush1.bf16.msra.mxu0 %v5236_v1  ;;  %2649 = vmatpush1.bf16.msra.mxu1 %v5371_v36 }
 0x4a5   : > { %2607 = vmatprep.subr.bf16.mxu0 %v5242_v2  ;;  %2650 = vmatprep.subr.bf16.mxu1 %v5377_v51 }
 0x4a8   : > { %2608 = vmatpush1.bf16.msra.mxu0 %v5248_v4  ;;  %2651 = vmatpush1.bf16.msra.mxu1 %v5383_v52 }
 0x4a9   : > { %2609 = vmatprep.subr.bf16.mxu0 %v5254_v5  ;;  %2652 = vmatprep.subr.bf16.mxu1 %v5389_v55 }
 0x4ac   : > { %2610 = vmatpush1.bf16.msra.mxu0 %v5260_v47  ;;  %2653 = vmatpush1.bf16.msra.mxu1 %v5395_v19 }
 0x4ad   : > { %2940 = vmatprep.subr.bf16.mxu0 %v5171_v53  ;;  %2983 = vmatprep.subr.bf16.mxu1 %v5306_v41 }
 0x562   : > { %v2284_v14 = vpop.f32.mrb[16].mxu0  ;;  %v2327_v38 = vpop.f32.mrb[32].mxu1 }
 0x563   : > { %v2344_v12 = vadd.f32 %v2284_v14, %v458_v28  ;;  %v2286_v37 = vpop.f32.mrb[17].mxu0  ;;  %v2329_v39 = vpop.f32.mrb[33].mxu1  ;;  %v4170_v8 = vadd.f32 %v2327_v38, %v5080_v17 }
 0x564   : > { %v2345_v53 = vadd.f32 %v2286_v37, %v460_v13  ;;  %v2288_v23 = vpop.f32.mrb[18].mxu0  ;;  %v2331_v34 = vpop.f32.mrb[34].mxu1  ;;  %v4171_v9 = vadd.f32 %v2329_v39, %v5082_v32 }
 0x565   : > { %v3923_v27 = vmul.f32 -1.442695, %v2344_v12  ;;  %v2348_v15 = vadd.f32 %v2288_v23, %v462_v21  ;;  %v2290_v6 = vpop.f32.mrb[19].mxu0  ;;  %v2333_v22 = vpop.f32.mrb[35].mxu1  ;;  %v4172_v44 = vadd.f32 %v2331_v34, %v5080_v17  ;;  %v3925_v28 = vmul.f32 -1.442695, %v4170_v8 }
 0x566   : > { %v3924_v18 = vmul.f32 -1.442695, %v2345_v53  ;;  %v2349_v7 = vadd.f32 %v2290_v6, %v464_v35  ;;  %v4173_v53 = vadd.f32 %v2333_v22, %v5082_v32 }
 0x567   : > { %4512 = vpow2.f32 %v3923_v27  ;;  %v3926_v31 = vmul.f32 -1.442695, %v2348_v15  ;;  %v3928_v14 = vmul.f32 -1.442695, %v4172_v44 }
 0x568   : > { %v3927_v26 = vmul.f32 -1.442695, %v2349_v7  ;;  %4514 = vpow2.f32 %v3924_v18 }
 0x569   : > { %4516 = vpow2.f32 %v3926_v31 }
 0x56a   : > { %4518 = vpow2.f32 %v3927_v26 }
 0x56b   : > { %4520 = vtanh.f32 %v4171_v9 }
 0x56c   : > { %4522 = vpow2.f32 %v3925_v28 }
 0x571   : > { %v4513_v13 = vpop.eup %4512 }
 0x572   : > { %v2370_v21 = vadd.f32 1.0, %v4513_v13  ;;  %v4515_v12 = vpop.eup %4514 }
 0x573   : > { %v4517_v37 = vpop.eup %4516  ;;  %v2371_v35 = vadd.f32 1.0, %v4515_v12 }
 0x574   : > { %4524 = vrcp.f32 %v2370_v21  ;;  %v2373_v23 = vadd.f32 1.0, %v4517_v37  ;;  %v4519_v38 = vpop.eup %4518 }
 0x575   : > { %4526 = vpow2.f32 %v3928_v14  ;;  %v2374_v34 = vadd.f32 1.0, %v4519_v38  ;;  %v4521_v39 = vpop.eup %4520 }
 0x576   : > { %4528 = vrcp.f32 %v2371_v35  ;;  %v4523_v27 = vpop.eup %4522 }
 0x577   : > { %4530 = vrcp.f32 %v2373_v23  ;;  %v2372_v26 = vadd.f32 1.0, %v4523_v27 }
 0x578   : > { %4532 = vtanh.f32 %v4173_v53 }
 0x579   : > { %4534 = vrcp.f32 %v2374_v34 }
 0x57a   : > { %4536 = vrcp.f32 %v2372_v26 }
 0x57e   : > { %v4525_v15 = vpop.eup %4524 }
 0x57f   : > { %v4527_v6 = vpop.eup %4526  ;;  %v2392_v18 = vmul.f32 %v4525_v15, %v5410_v20 }
 0x580   : > { %v4529_v7 = vpop.eup %4528  ;;  %v2375_v13 = vadd.f32 1.0, %v4527_v6 }
 0x581   : > { %v4531_v31 = vpop.eup %4530  ;;  %v2390_v8 = vmul.f32 %v4529_v7, %v4521_v39 }
 0x582   : > { %v4533_v44 = vpop.eup %4532  ;;  %v2393_v22 = vmul.f32 %v4531_v31, %v5413_v49 }
 0x583   : > { %v4535_v9 = vpop.eup %4534  ;;  %v5468_v28 = vadd.f32 %v2392_v18, %v2390_v8 }
 0x584   : > { %v2391_v14 = vmul.f32 %v4535_v9, %v4533_v44  ;;  %v4537_v20 = vpop.eup %4536 }
 0x585   : > { %4538 = vtanh.f32 %v5468_v28 }
 0x586   : > { %v5471_v21 = vadd.f32 %v2393_v22, %v2391_v14  ;;  %4540 = vrcp.f32 %v2375_v13 }
 0x588   : > { %4542 = vtanh.f32 %v5471_v21 }
 0x58f   : > { %v4539_v12 = vpop.eup %4538 }
 0x590   : > { %v4541_v37 = vpop.eup %4540  ;;  %v2398_v53 = vmul.f32 %v4539_v12, %v4537_v20 }
 0x592   : > { %v4543_v35 = vpop.eup %4542 }
 0x593   : > { %v2399_v23 = vmul.f32 %v4543_v35, %v4541_v37 }
 0x595   : > { %v5474_v49 = vpack.c.bf16 %v2399_v23, %v2398_v53 }
 0x597   : > { %2628 = vmatmul.mubr.bf16.vlgmr.msra.gmra.mrb[20].mxu0 %v5474_v49  ;;  %2671 = vmatmul.mubr.bf16.vlgmr.msra.gmra.mrb[36].mxu1 %v5474_v49 }
 0x598   : > { %2941 = vmatpush1.bf16.msra.mxu0 %v5176_v54  ;;  %2984 = vmatpush1.bf16.msra.mxu1 %v5311_v45  ;;  %v468_v54 = vadd.f32 %v5045_v10, %v5072_v42 }
 0x599   : > { %2942 = vmatprep.subr.bf16.mxu0 %v5183_v56  ;;  %2985 = vmatprep.subr.bf16.mxu1 %v5318_v48  ;;  %v470_v56 = vadd.f32 %v5047_v11, %v5074_v43 }
 0x59a   : > { %2972 = vmatprep.mubr.bf16.mxu0 %v5731_v33  ;;  %3015 = vmatprep.mubr.bf16.mxu1 %v5731_v33 }
 0x59c   : > { %2943 = vmatpush1.bf16.msra.mxu0 %v5188_v57  ;;  %2986 = vmatpush1.bf16.msra.mxu1 %v5323_v16 }
 0x59d   : > { %2944 = vmatprep.subr.bf16.mxu0 %v5195_v58  ;;  %2987 = vmatprep.subr.bf16.mxu1 %v5330_v29 }
 0x5a0   : > { %2945 = vmatpush1.bf16.msra.mxu0 %v5200_v59  ;;  %2988 = vmatpush1.bf16.msra.mxu1 %v5335_v50  ;;  %v5734_v59 = vld [vmem:[#allocation6_spill] sm:$0xff] }
 0x5a1   : > { %2946 = vmatprep.subr.bf16.mxu0 %v5207_v60  ;;  %2989 = vmatprep.subr.bf16.mxu1 %v5342_v40  ;;  %v472_v60 = vadd.f32 %v5734_v59, %v5072_v42 }
 0x5a4   : > { %2947 = vmatpush1.bf16.msra.mxu0 %v5212_v61  ;;  %2990 = vmatpush1.bf16.msra.mxu1 %v5347_v30 }
 0x5a5   : > { %2948 = vmatprep.subr.bf16.mxu0 %v5224_v63  ;;  %2991 = vmatprep.subr.bf16.mxu1 %v5359_v3 }
 0x5a8   : > { %2949 = vmatpush1.bf16.msra.mxu0 %v5219_v62  ;;  %2992 = vmatpush1.bf16.msra.mxu1 %v5354_v46 }
 0x5a9   : > { %2950 = vmatprep.subr.bf16.mxu0 %v5229_v0  ;;  %2993 = vmatprep.subr.bf16.mxu1 %v5364_v25  ;;  %v5735_v0 = vld [vmem:[#allocation7_spill] sm:$0xff] }
 0x5ac   : > { %2951 = vmatpush1.bf16.msra.mxu0 %v5236_v1  ;;  %2994 = vmatpush1.bf16.msra.mxu1 %v5371_v36  ;;  %v474_v1 = vadd.f32 %v5735_v0, %v5074_v43 }
 0x5ad   : > { %2952 = vmatprep.subr.bf16.mxu0 %v5242_v2  ;;  %2995 = vmatprep.subr.bf16.mxu1 %v5377_v51 }
 0x5b0   : > { %2953 = vmatpush1.bf16.msra.mxu0 %v5248_v4  ;;  %2996 = vmatpush1.bf16.msra.mxu1 %v5383_v52 }
 0x5b1   : > { %2954 = vmatprep.subr.bf16.mxu0 %v5254_v5  ;;  %2997 = vmatprep.subr.bf16.mxu1 %v5389_v55 }
 0x5b4   : > { %2955 = vmatpush1.bf16.msra.mxu0 %v5260_v47  ;;  %2998 = vmatpush1.bf16.msra.mxu1 %v5395_v19 }
 0x5b5   : > { %3328 = vmatprep.subr.bf16.mxu1 %v5306_v41 }
 0x66a   : > { %v2629_v57 = vpop.f32.mrb[20].mxu0  ;;  %v2672_v58 = vpop.f32.mrb[36].mxu1 }
 0x66b   : > { %v2689_v61 = vadd.f32 %v2629_v57, %v468_v54  ;;  %v2631_v62 = vpop.f32.mrb[21].mxu0  ;;  %v2674_v63 = vpop.f32.mrb[37].mxu1  ;;  %v4174_v15 = vadd.f32 %v2672_v58, %v5080_v17 }
 0x66c   : > { %v2690_v2 = vadd.f32 %v2631_v62, %v470_v56  ;;  %v2633_v4 = vpop.f32.mrb[22].mxu0  ;;  %v2676_v5 = vpop.f32.mrb[38].mxu1  ;;  %v4175_v18 = vadd.f32 %v2674_v63, %v5082_v32 }
 0x66d   : > { %v3961_v47 = vmul.f32 -1.442695, %v2689_v61  ;;  %v2693_v41 = vadd.f32 %v2633_v4, %v472_v60  ;;  %v2635_v10 = vpop.f32.mrb[23].mxu0  ;;  %v2678_v38 = vpop.f32.mrb[39].mxu1  ;;  %v4176_v6 = vadd.f32 %v2676_v5, %v5080_v17  ;;  %v3963_v7 = vmul.f32 -1.442695, %v4174_v15 }
 0x66e   : > { %v3962_v34 = vmul.f32 -1.442695, %v2690_v2  ;;  %v2694_v11 = vadd.f32 %v2635_v10, %v474_v1  ;;  %v4177_v13 = vadd.f32 %v2678_v38, %v5082_v32  ;;  %v5603_v38 = vld [vmem:[%s5712_s4] sm:$0xff]  }
 0x66f   : > { %4544 = vpow2.f32 %v3961_v47  ;;  %v3964_v39 = vmul.f32 -1.442695, %v2693_v41  ;;  %v3966_v26 = vmul.f32 -1.442695, %v4176_v6 }
 0x670   : > { %v3965_v27 = vmul.f32 -1.442695, %v2694_v11  ;;  %4546 = vpow2.f32 %v3962_v34  ;;  %v5736_v34 = vld [vmem:[#allocation8_spill] sm:$0xff] }
 0x671   : > { %4548 = vpow2.f32 %v3964_v39  ;;  %v478_v11 = vadd.f32 %v5736_v34, %v5072_v42  ;;  %v5737_v39 = vld [vmem:[#allocation9_spill] sm:$0xff] }
 0x672   : > { %4550 = vpow2.f32 %v3965_v27  ;;  %v480_v27 = vadd.f32 %v5737_v39, %v5074_v43 }
 0x673   : > { %4552 = vtanh.f32 %v4175_v18  ;;  %v5738_v18 = vld [vmem:[#allocation10_spill] sm:$0xff] }
 0x674   : > { %4554 = vpow2.f32 %v3963_v7  ;;  %v482_v7 = vadd.f32 %v5738_v18, %v5072_v42  ;;  %v5740_v18 = vld [vmem:[#allocation16_spill] sm:$0xff] }
 0x679   : > { %v4545_v31 = vpop.eup %4544 }
 0x67a   : > { %v2715_v8 = vadd.f32 1.0, %v4545_v31  ;;  %v4547_v44 = vpop.eup %4546 }
 0x67b   : > { %v4549_v22 = vpop.eup %4548  ;;  %v2716_v9 = vadd.f32 1.0, %v4547_v44  ;;  %v5739_v44 = vld [vmem:[#allocation11_spill] sm:$0xff] }
 0x67c   : > { %4556 = vrcp.f32 %v2715_v8  ;;  %v2718_v14 = vadd.f32 1.0, %v4549_v22  ;;  %v4551_v20 = vpop.eup %4550  ;;  %v484_v22 = vadd.f32 %v5739_v44, %v5074_v43  ;;  %v4383_v44 = vld [vmem:[%s5712_s4 + $0x38] sm:$0xff]  }
 0x67d   : > { %4558 = vpow2.f32 %v3966_v26  ;;  %v2719_v12 = vadd.f32 1.0, %v4551_v20  ;;  %v4553_v37 = vpop.eup %4552 }
 0x67e   : > { %4560 = vrcp.f32 %v2716_v9  ;;  %v4555_v35 = vpop.eup %4554 }
 0x67f   : > { %4562 = vrcp.f32 %v2718_v14  ;;  %v2717_v58 = vadd.f32 1.0, %v4555_v35 }
 0x680   : > { %4564 = vtanh.f32 %v4177_v13 }
 0x681   : > { %4566 = vrcp.f32 %v2719_v12 }
 0x682   : > { %4568 = vrcp.f32 %v2717_v58 }
 0x686   : > { %v4557_v53 = vpop.eup %4556 }
 0x687   : > { %v4559_v23 = vpop.eup %4558  ;;  %v2737_v54 = vmul.f32 %v4557_v53, %v5468_v28 }
 0x688   : > { %v4561_v56 = vpop.eup %4560  ;;  %v2720_v0 = vadd.f32 1.0, %v4559_v23 }
 0x689   : > { %v4563_v57 = vpop.eup %4562  ;;  %v2735_v59 = vmul.f32 %v4561_v56, %v4553_v37 }
 0x68a   : > { %v4565_v60 = vpop.eup %4564  ;;  %v2738_v61 = vmul.f32 %v4563_v57, %v5471_v21 }
 0x68b   : > { %v4567_v62 = vpop.eup %4566  ;;  %v5525_v63 = vadd.f32 %v2737_v54, %v2735_v59 }
 0x68c   : > { %v2736_v1 = vmul.f32 %v4567_v62, %v4565_v60  ;;  %v4569_v28 = vpop.eup %4568 }
 0x68d   : > { %4570 = vtanh.f32 %v5525_v63 }
 0x68e   : > { %v5528_v2 = vadd.f32 %v2738_v61, %v2736_v1  ;;  %4572 = vrcp.f32 %v2720_v0 }
 0x690   : > { %4574 = vtanh.f32 %v5528_v2 }
 0x697   : > { %v4571_v4 = vpop.eup %4570 }
 0x698   : > { %v4573_v5 = vpop.eup %4572  ;;  %v2743_v41 = vmul.f32 %v4571_v4, %v4569_v28 }
 0x69a   : > { %v4575_v47 = vpop.eup %4574 }
 0x69b   : > { %v2744_v10 = vmul.f32 %v4575_v47, %v4573_v5 }
 0x69d   : > { %v5531_v21 = vpack.c.bf16 %v2744_v10, %v2743_v41 }
 0x69f   : > { %2973 = vmatmul.mubr.bf16.vlgmr.msra.gmra.mrb[24].mxu0 %v5531_v21  ;;  %3016 = vmatmul.mubr.bf16.vlgmr.msra.gmra.mrb[40].mxu1 %v5531_v21 }
 0x6a0   : > { %3329 = vmatpush1.bf16.msra.mxu1 %v5311_v45  ;;  %3317 = vmatprep.mubr.bf16.mxu0 %v5731_v33  ;;  %v4352_v45 = vld [vmem:[%s5711_s3] ss:$16 sps:$4 sm:$0xff]  }
 0x6a1   : > { %3330 = vmatprep.subr.bf16.mxu1 %v5318_v48  ;;  %3360 = vmatprep.mubr.bf16.mxu1 %v5731_v33  ;;  %v4354_v33 = vld [vmem:[%s5711_s3 + $0x4] ss:$16 sps:$4 sm:$0xff]  }
 0x6a2   : > { %3285 = vmatprep.subr.bf16.mxu0 %v4354_v33  ;;  %v4357_v48 = vld [vmem:[%s5711_s3 + $0x24] ss:$16 sps:$4 sm:$0xff]  }
 0x6a3   : > { %3286 = vmatpush1.bf16.msra.mxu0 %v4352_v45 }
 0x6a4   : > { %3331 = vmatpush1.bf16.msra.mxu1 %v5323_v16  ;;  %v4355_v16 = vld [vmem:[%s5711_s3 + $0x20] ss:$16 sps:$4 sm:$0xff]   ;;  %3287 = vmatprep.subr.bf16.mxu0 %v4357_v48 }
 0x6a5   : > { %3332 = vmatprep.subr.bf16.mxu1 %v5330_v29  ;;  %v4360_v29 = vld [vmem:[%s5711_s3 + $0x44] ss:$16 sps:$4 sm:$0xff]  }
 0x6a7   : > { %3288 = vmatpush1.bf16.msra.mxu0 %v4355_v16 }
 0x6a8   : > { %3333 = vmatpush1.bf16.msra.mxu1 %v5335_v50  ;;  %v4358_v50 = vld [vmem:[%s5711_s3 + $0x40] ss:$16 sps:$4 sm:$0xff]   ;;  %3289 = vmatprep.subr.bf16.mxu0 %v4360_v29 }
 0x6a9   : > { %3334 = vmatprep.subr.bf16.mxu1 %v5342_v40  ;;  %v4363_v40 = vld [vmem:[%s5711_s3 + $0x64] ss:$16 sps:$4 sm:$0xff]  }
 0x6ab   : > { %3290 = vmatpush1.bf16.msra.mxu0 %v4358_v50 }
 0x6ac   : > { %3335 = vmatpush1.bf16.msra.mxu1 %v5347_v30  ;;  %v4361_v30 = vld [vmem:[%s5711_s3 + $0x60] ss:$16 sps:$4 sm:$0xff]   ;;  %3291 = vmatprep.subr.bf16.mxu0 %v4363_v40 }
 0x6ad   : > { %3336 = vmatprep.subr.bf16.mxu1 %v5359_v3  ;;  %v4364_v3 = vld [vmem:[%s5711_s3 + $0x80] ss:$16 sps:$4 sm:$0xff]  }
 0x6af   : > { %3292 = vmatpush1.bf16.msra.mxu0 %v4361_v30 }
 0x6b0   : > { %3337 = vmatpush1.bf16.msra.mxu1 %v5354_v46  ;;  %v4366_v46 = vld [vmem:[%s5711_s3 + $0x84] ss:$16 sps:$4 sm:$0xff]  }
 0x6b1   : > { %3338 = vmatprep.subr.bf16.mxu1 %v5364_v25  ;;  %v4369_v25 = vld [vmem:[%s5711_s3 + $0xa4] ss:$16 sps:$4 sm:$0xff]   ;;  %3293 = vmatprep.subr.bf16.mxu0 %v4366_v46 }
 0x6b3   : > { %3294 = vmatpush1.bf16.msra.mxu0 %v4364_v3 }
 0x6b4   : > { %3339 = vmatpush1.bf16.msra.mxu1 %v5371_v36  ;;  %v4367_v36 = vld [vmem:[%s5711_s3 + $0xa0] ss:$16 sps:$4 sm:$0xff]   ;;  %3295 = vmatprep.subr.bf16.mxu0 %v4369_v25 }
 0x6b5   : > { %3340 = vmatprep.subr.bf16.mxu1 %v5377_v51  ;;  %v4372_v51 = vld [vmem:[%s5711_s3 + $0xc4] ss:$16 sps:$4 sm:$0xff]  }
 0x6b7   : > { %3296 = vmatpush1.bf16.msra.mxu0 %v4367_v36 }
 0x6b8   : > { %3341 = vmatpush1.bf16.msra.mxu1 %v5383_v52  ;;  %v4370_v52 = vld [vmem:[%s5711_s3 + $0xc0] ss:$16 sps:$4 sm:$0xff]   ;;  %3297 = vmatprep.subr.bf16.mxu0 %v4372_v51 }
 0x6b9   : > { %3342 = vmatprep.subr.bf16.mxu1 %v5389_v55  ;;  %v4375_v55 = vld [vmem:[%s5711_s3 + $0xe4] ss:$16 sps:$4 sm:$0xff]  }
 0x6bb   : > { %3298 = vmatpush1.bf16.msra.mxu0 %v4370_v52 }
 0x6bc   : > { %3343 = vmatpush1.bf16.msra.mxu1 %v5395_v19  ;;  %v4373_v19 = vld [vmem:[%s5711_s3 + $0xe0] ss:$16 sps:$4 sm:$0xff]   ;;  %3299 = vmatprep.subr.bf16.mxu0 %v4375_v55 }
 0x6bf   : > { %3300 = vmatpush1.bf16.msra.mxu0 %v4373_v19 }
 0x6c0   : > { %4070 = vmatprep.subr.bf16.mxu0 %v5603_v38 }
 0x772   : > { %v2974_v15 = vpop.f32.mrb[24].mxu0  ;;  %v3017_v6 = vpop.f32.mrb[40].mxu1 }
 0x773   : > { %v3034_v31 = vadd.f32 %v2974_v15, %v478_v11  ;;  %v2976_v26 = vpop.f32.mrb[25].mxu0  ;;  %v3019_v8 = vpop.f32.mrb[41].mxu1  ;;  %v4178_v57 = vadd.f32 %v3017_v6, %v5080_v17  ;;  %v4377_v6 = vld [vmem:[%s5712_s4 + $0x8] sm:$0xff]  }
 0x774   : > { %v3035_v9 = vadd.f32 %v2976_v26, %v480_v27  ;;  %v2978_v13 = vpop.f32.mrb[26].mxu0  ;;  %v3021_v14 = vpop.f32.mrb[42].mxu1  ;;  %v4179_v59 = vadd.f32 %v3019_v8, %v5082_v32  ;;  %v4380_v26 = vld [vmem:[%s5712_s4 + $0x20] sm:$0xff]   ;;  %v4382_v8 = vld [vmem:[%s5712_s4 + $0x30] sm:$0xff]  }
 0x775   : > { %v3999_v20 = vmul.f32 -1.442695, %v3034_v31  ;;  %v3038_v12 = vadd.f32 %v2978_v13, %v482_v7  ;;  %v2980_v37 = vpop.f32.mrb[27].mxu0  ;;  %v3023_v35 = vpop.f32.mrb[43].mxu1  ;;  %v4180_v58 = vadd.f32 %v3021_v14, %v5080_v17  ;;  %v4001_v60 = vmul.f32 -1.442695, %v4178_v57 }
 0x776   : > { %v4000_v53 = vmul.f32 -1.442695, %v3035_v9  ;;  %v3039_v23 = vadd.f32 %v2980_v37, %v484_v22  ;;  %v4181_v5 = vadd.f32 %v3023_v35, %v5082_v32  ;;  %v4378_v7 = vld [vmem:[%s5712_s4 + $0x10] sm:$0xff]   ;;  %v4379_v31 = vld [vmem:[%s5712_s4 + $0x18] sm:$0xff]   ;;  %v5742_v9 = vld [vmem:[#allocation18_spill] sm:$0xff] }
 0x777   : > { %4576 = vpow2.f32 %v3999_v20  ;;  %v4002_v54 = vmul.f32 -1.442695, %v3038_v12  ;;  %v4004_v62 = vmul.f32 -1.442695, %v4180_v58  ;;  %v5741_v22 = vld [vmem:[#allocation17_spill] sm:$0xff]  ;;  %v5743_v13 = vld [vmem:[#allocation12_spill] sm:$0xff] }
 0x778   : > { %v4003_v56 = vmul.f32 -1.442695, %v3039_v23  ;;  %4578 = vpow2.f32 %v4000_v53  ;;  %v488_v14 = vadd.f32 %v5743_v13, %v5072_v42  ;;  %v5744_v20 = vld [vmem:[#allocation13_spill] sm:$0xff]  ;;  %v5745_v53 = vld [vmem:[#allocation14_spill] sm:$0xff] }
 0x779   : > { %4580 = vpow2.f32 %v4002_v54  ;;  %v490_v12 = vadd.f32 %v5744_v20, %v5074_v43  ;;  %v492_v23 = vadd.f32 %v5745_v53, %v5072_v42 }
 0x77a   : > { %4582 = vpow2.f32 %v4003_v56 }
 0x77b   : > { %4584 = vtanh.f32 %v4179_v59 }
 0x77c   : > { %4586 = vpow2.f32 %v4001_v60 }
 0x781   : > { %v4577_v61 = vpop.eup %4576 }
 0x782   : > { %v3060_v0 = vadd.f32 1.0, %v4577_v61  ;;  %v4579_v1 = vpop.eup %4578 }
 0x783   : > { %v4581_v28 = vpop.eup %4580  ;;  %v3061_v4 = vadd.f32 1.0, %v4579_v1 }
 0x784   : > { %4588 = vrcp.f32 %v3060_v0  ;;  %v3063_v47 = vadd.f32 1.0, %v4581_v28  ;;  %v4583_v41 = vpop.eup %4582 }
 0x785   : > { %4590 = vpow2.f32 %v4004_v62  ;;  %v3064_v10 = vadd.f32 1.0, %v4583_v41  ;;  %v4585_v33 = vpop.eup %4584 }
 0x786   : > { %4592 = vrcp.f32 %v3061_v4  ;;  %v4587_v45 = vpop.eup %4586 }
 0x787   : > { %4594 = vrcp.f32 %v3063_v47  ;;  %v3062_v30 = vadd.f32 1.0, %v4587_v45 }
 0x788   : > { %4596 = vtanh.f32 %v4181_v5 }
 0x789   : > { %4598 = vrcp.f32 %v3064_v10 }
 0x78a   : > { %4600 = vrcp.f32 %v3062_v30 }
 0x78e   : > { %v4589_v48 = vpop.eup %4588 }
 0x78f   : > { %v4591_v16 = vpop.eup %4590  ;;  %v3082_v29 = vmul.f32 %v4589_v48, %v5525_v63 }
 0x790   : > { %v4593_v50 = vpop.eup %4592  ;;  %v3065_v52 = vadd.f32 1.0, %v4591_v16 }
 0x791   : > { %v4595_v40 = vpop.eup %4594  ;;  %v3080_v46 = vmul.f32 %v4593_v50, %v4585_v33 }
 0x792   : > { %v4597_v3 = vpop.eup %4596  ;;  %v3083_v25 = vmul.f32 %v4595_v40, %v5528_v2 }
 0x793   : > { %v4599_v36 = vpop.eup %4598  ;;  %v5620_v51 = vadd.f32 %v3082_v29, %v3080_v46 }
 0x794   : > { %v3081_v55 = vmul.f32 %v4599_v36, %v4597_v3  ;;  %v4601_v63 = vpop.eup %4600 }
 0x795   : > { %4602 = vtanh.f32 %v5620_v51 }
 0x796   : > { %v5623_v19 = vadd.f32 %v3083_v25, %v3081_v55  ;;  %4604 = vrcp.f32 %v3065_v52 }
 0x798   : > { %4606 = vtanh.f32 %v5623_v19 }
 0x79f   : > { %v4603_v34 = vpop.eup %4602 }
 0x7a0   : > { %v4605_v11 = vpop.eup %4604  ;;  %v3088_v27 = vmul.f32 %v4603_v34, %v4601_v63 }
 0x7a2   : > { %v4607_v39 = vpop.eup %4606 }
 0x7a3   : > { %v3089_v15 = vmul.f32 %v4607_v39, %v4605_v11 }
 0x7a5   : > { %v3092_v2 = vpack.c.bf16 %v3089_v15, %v3088_v27 }
 0x7a7   : > { %3318 = vmatmul.mubr.bf16.vlgmr.msra.gmra.mrb[28].mxu0 %v3092_v2  ;;  %3361 = vmatmul.mubr.bf16.vlgmr.msra.gmra.mrb[44].mxu1 %v3092_v2 }
 0x7a8   : > { %4071 = vmatpush3.bf16.msra.mxu0 %v5603_v38  ;;  %4086 = vmatprep.mubr.bf16.mxu0 %v5740_v18  ;;  %v4381_v38 = vld [vmem:[%s5712_s4 + $0x28] sm:$0xff]  }
 0x7a9   : > { %4072 = vmatprep.subr.bf16.mxu0 %v4377_v6 }
 0x7ac   : > { %4073 = vmatpush3.bf16.msra.mxu0 %v4377_v6 }
 0x7ad   : > { %4074 = vmatprep.subr.bf16.mxu0 %v4378_v7 }
 0x7b0   : > { %4075 = vmatpush3.bf16.msra.mxu0 %v4378_v7 }
 0x7b1   : > { %4076 = vmatprep.subr.bf16.mxu0 %v4379_v31 }
 0x7b4   : > { %4077 = vmatpush3.bf16.msra.mxu0 %v4379_v31 }
 0x7b5   : > { %4078 = vmatprep.subr.bf16.mxu0 %v4380_v26 }
 0x7b8   : > { %4079 = vmatpush3.bf16.msra.mxu0 %v4380_v26 }
 0x7b9   : > { %4080 = vmatprep.subr.bf16.mxu0 %v4381_v38 }
 0x7bc   : > { %4081 = vmatpush3.bf16.msra.mxu0 %v4381_v38 }
 0x7bd   : > { %4082 = vmatprep.subr.bf16.mxu0 %v4382_v8 }
 0x7c0   : > { %4083 = vmatpush3.bf16.msra.mxu0 %v4382_v8 }
 0x7c1   : > { %4084 = vmatprep.subr.bf16.mxu0 %v4383_v44 }
 0x7c4   : > { %4085 = vmatpush3.bf16.msra.mxu0 %v4383_v44 }
 0x7c7   : > { %4087 = vmatmul.mubr.bf16.vlgmr.msra.gmra.mrb[32].mxu0 %v5741_v22 }
 0x7c8   : > { %4090 = vmatprep.mubr.bf16.mxu0 %v5742_v9 }
 0x7cf   : > { %4091 = vmatmul.mubr.bf16.gmra.mrb[36].mxu0 %v5416_v24  ;;  %v5746_v24 = vld [vmem:[#allocation15_spill] sm:$0xff] }
 0x7d0   : > { %4094 = vmatprep.mubr.bf16.mxu0 %v5474_v49  ;;  %v494_v49 = vadd.f32 %v5746_v24, %v5074_v43 }
 0x7d7   : > { %4095 = vmatmul.mubr.bf16.gmra.mrb[40].mxu0 %v5531_v21 }
 0x7d8   : > { %4098 = vmatprep.mubr.bf16.mxu0 %v3092_v2 }
 0x87a   : > { %v3319_v37 = vpop.f32.mrb[28].mxu0  ;;  %v3362_v35 = vpop.f32.mrb[44].mxu1 }
 0x87b   : > { %v3379_v54 = vadd.f32 %v3319_v37, %v488_v14  ;;  %v3321_v56 = vpop.f32.mrb[29].mxu0  ;;  %v3364_v57 = vpop.f32.mrb[45].mxu1  ;;  %v4182_v42 = vadd.f32 %v3362_v35, %v5080_v17 }
 0x87c   : > { %v3380_v58 = vadd.f32 %v3321_v56, %v490_v12  ;;  %v3323_v21 = vpop.f32.mrb[30].mxu0  ;;  %v3366_v59 = vpop.f32.mrb[46].mxu1  ;;  %v4183_v43 = vadd.f32 %v3364_v57, %v5082_v32 }
 0x87d   : > { %v4037_v60 = vmul.f32 -1.442695, %v3379_v54  ;;  %v3383_v61 = vadd.f32 %v3323_v21, %v492_v23  ;;  %v3325_v62 = vpop.f32.mrb[31].mxu0  ;;  %v3368_v0 = vpop.f32.mrb[47].mxu1  ;;  %v4184_v47 = vadd.f32 %v3366_v59, %v5080_v17  ;;  %v4039_v41 = vmul.f32 -1.442695, %v4182_v42 }
 0x87e   : > { %v4038_v1 = vmul.f32 -1.442695, %v3380_v58  ;;  %v3384_v28 = vadd.f32 %v3325_v62, %v494_v49  ;;  %v4185_v50 = vadd.f32 %v3368_v0, %v5082_v32  ;;  %v5670_v32 = vld [vmem:[%s5713_s5] ss:$0 sm:$0xff] }
 0x87f   : > { %4608 = vpow2.f32 %v4037_v60  ;;  %v4040_v4 = vmul.f32 -1.442695, %v3383_v61  ;;  %v4042_v33 = vmul.f32 -1.442695, %v4184_v47 }
 0x880   : > { %v4041_v5 = vmul.f32 -1.442695, %v3384_v28  ;;  %4610 = vpow2.f32 %v4038_v1 }
 0x881   : > { %4612 = vpow2.f32 %v4040_v4 }
 0x882   : > { %4614 = vpow2.f32 %v4041_v5 }
 0x883   : > { %4616 = vtanh.f32 %v4183_v43 }
 0x884   : > { %4618 = vpow2.f32 %v4039_v41 }
 0x889   : > { %v4609_v10 = vpop.eup %4608 }
 0x88a   : > { %v3405_v45 = vadd.f32 1.0, %v4609_v10  ;;  %v4611_v48 = vpop.eup %4610 }
 0x88b   : > { %v4613_v16 = vpop.eup %4612  ;;  %v3406_v29 = vadd.f32 1.0, %v4611_v48 }
 0x88c   : > { %4620 = vrcp.f32 %v3405_v45  ;;  %v3408_v40 = vadd.f32 1.0, %v4613_v16  ;;  %v4615_v30 = vpop.eup %4614 }
 0x88d   : > { %4622 = vpow2.f32 %v4042_v33  ;;  %v3409_v17 = vadd.f32 1.0, %v4615_v30  ;;  %v4617_v46 = vpop.eup %4616 }
 0x88e   : > { %4624 = vrcp.f32 %v3406_v29  ;;  %v4619_v3 = vpop.eup %4618 }
 0x88f   : > { %4626 = vrcp.f32 %v3408_v40  ;;  %v3407_v63 = vadd.f32 1.0, %v4619_v3 }
 0x890   : > { %4628 = vtanh.f32 %v4185_v50 }
 0x891   : > { %4630 = vrcp.f32 %v3409_v17 }
 0x892   : > { %4632 = vrcp.f32 %v3407_v63 }
 0x896   : > { %v4621_v25 = vpop.eup %4620 }
 0x897   : > { %v4623_v36 = vpop.eup %4622  ;;  %v3427_v52 = vmul.f32 %v4621_v25, %v5620_v51 }
 0x898   : > { %v4625_v55 = vpop.eup %4624  ;;  %v3410_v18 = vadd.f32 1.0, %v4623_v36 }
 0x899   : > { %v4627_v34 = vpop.eup %4626  ;;  %v3425_v11 = vmul.f32 %v4625_v55, %v4617_v46 }
 0x89a   : > { %v4629_v39 = vpop.eup %4628  ;;  %v3428_v27 = vmul.f32 %v4627_v34, %v5623_v19  ;;  %v4088_v15 = vpop.f32.mrb[32].mxu0 }
 0x89b   : > { %v4631_v2 = vpop.eup %4630  ;;  %v3429_v6 = vadd.f32 %v3427_v52, %v3425_v11  ;;  %v3579_v51 = vadd.f32 %v4088_v15, %v5670_v32  ;;  %v3570_v7 = vpop.f32.mrb[33].mxu0 }
 0x89c   : > { %v3426_v31 = vmul.f32 %v4631_v2, %v4629_v39  ;;  %v3571_v26 = vadd.f32 %v5670_v32, %v3570_v7  ;;  %v4089_v38 = vpop.f32.mrb[34].mxu0  ;;  %v4633_v53 = vpop.eup %4632 }
 0x89d   : > { %4634 = vtanh.f32 %v3429_v6  ;;  %3439 = vst [vmem:[#allocation5] sm:$0xff] %v3429_v6  ;;  %3635 = vst [vmem:[%s4701_s30 + $0x10] sm:$0xff] %v3579_v51  ;;  %v3582_v19 = vadd.f32 %v4089_v38, %v5670_v32  ;;  %v3573_v8 = vpop.f32.mrb[35].mxu0 }
 0x89e   : > { %v3430_v44 = vadd.f32 %v3428_v27, %v3426_v31  ;;  %3633 = vst [vmem:[%s4701_s30] sm:$0xff] %v3571_v26  ;;  %v3574_v22 = vadd.f32 %v5670_v32, %v3573_v8  ;;  %4636 = vrcp.f32 %v3410_v18 }
 0x89f   : > { %3636 = vst [vmem:[%s4701_s30 + $0x18] sm:$0xff] %v3582_v19 }
 0x8a0   : > { %4638 = vtanh.f32 %v3430_v44  ;;  %3440 = vst [vmem:[#allocation5 + $0x8] sm:$0xff] %v3430_v44  ;;  %3634 = vst [vmem:[%s4701_s30 + $0x8] sm:$0xff] %v3574_v22 }
 0x8a2   : > { %v4092_v9 = vpop.f32.mrb[36].mxu0 }
 0x8a3   : > { %v3595_v13 = vadd.f32 %v4092_v9, %v5670_v32  ;;  %v3586_v14 = vpop.f32.mrb[37].mxu0 }
 0x8a4   : > { %v3587_v20 = vadd.f32 %v5670_v32, %v3586_v14  ;;  %v4093_v12 = vpop.f32.mrb[38].mxu0 }
 0x8a5   : > { %3639 = vst [vmem:[%s4701_s30 + $0x30] sm:$0xff] %v3595_v13  ;;  %v3598_v37 = vadd.f32 %v4093_v12, %v5670_v32  ;;  %v3589_v35 = vpop.f32.mrb[39].mxu0 }
 0x8a6   : > { %3637 = vst [vmem:[%s4701_s30 + $0x20] sm:$0xff] %v3587_v20  ;;  %v3590_v23 = vadd.f32 %v5670_v32, %v3589_v35 }
 0x8a7   : > { %v4635_v54 = vpop.eup %4634  ;;  %3640 = vst [vmem:[%s4701_s30 + $0x38] sm:$0xff] %v3598_v37 }
 0x8a8   : > { %3638 = vst [vmem:[%s4701_s30 + $0x28] sm:$0xff] %v3590_v23  ;;  %v3433_v56 = vmul.f32 %v4635_v54, %v4633_v53  ;;  %v4637_v57 = vpop.eup %4636 }
 0x8aa   : > { %v4639_v24 = vpop.eup %4638  ;;  %v4096_v49 = vpop.f32.mrb[40].mxu0  ;;  %3437 = vst [vmem:[#allocation4] sm:$0xff] %v3433_v56 }
 0x8ab   : > { %v3611_v58 = vadd.f32 %v4096_v49, %v5670_v32  ;;  %v3602_v21 = vpop.f32.mrb[41].mxu0  ;;  %v3434_v59 = vmul.f32 %v4639_v24, %v4637_v57 }
 0x8ac   : > { %v3603_v60 = vadd.f32 %v5670_v32, %v3602_v21  ;;  %v4097_v61 = vpop.f32.mrb[42].mxu0 }
 0x8ad   : > { %3643 = vst [vmem:[%s4701_s30 + $0x50] sm:$0xff] %v3611_v58  ;;  %v3614_v62 = vadd.f32 %v4097_v61, %v5670_v32  ;;  %v3605_v0 = vpop.f32.mrb[43].mxu0  ;;  %3438 = vst [vmem:[#allocation4 + $0x8] sm:$0xff] %v3434_v59  ;;  %v3464_v1 = vpack.c.bf16 %v3434_v59, %v3433_v56 }
 0x8ae   : > { %3641 = vst [vmem:[%s4701_s30 + $0x40] sm:$0xff] %v3603_v60  ;;  %v3606_v28 = vadd.f32 %v5670_v32, %v3605_v0 }
 0x8af   : > { %3644 = vst [vmem:[%s4701_s30 + $0x58] sm:$0xff] %v3614_v62  ;;  %4099 = vmatmul.mubr.bf16.gmra.mrb[44].mxu0 %v3464_v1 }
 0x8b0   : > { %3642 = vst [vmem:[%s4701_s30 + $0x48] sm:$0xff] %v3606_v28 }
 0x982   : > { %v4100_v4 = vpop.f32.mrb[44].mxu0 }
 0x983   : > { %v3627_v5 = vadd.f32 %v4100_v4, %v5670_v32  ;;  %v3618_v42 = vpop.f32.mrb[45].mxu0 }
 0x984   : > { %v3619_v47 = vadd.f32 %v5670_v32, %v3618_v42  ;;  %v4101_v43 = vpop.f32.mrb[46].mxu0 }
 0x985   : > { %3647 = vst [vmem:[%s4701_s30 + $0x70] sm:$0xff] %v3627_v5  ;;  %v3630_v41 = vadd.f32 %v4101_v43, %v5670_v32  ;;  %v3621_v10 = vpop.f32.mrb[47].mxu0 }
 0x986   : > { %3645 = vst [vmem:[%s4701_s30 + $0x60] sm:$0xff] %v3619_v47  ;;  %v3622_v33 = vadd.f32 %v5670_v32, %v3621_v10 }
 0x987   : > { %3648 = vst [vmem:[%s4701_s30 + $0x78] sm:$0xff] %v3630_v41 }
 0x988   : > { %3646 = vst [vmem:[%s4701_s30 + $0x68] sm:$0xff] %v3622_v33 }
 0x989 PF: > { %s16_s21 = sadd.s32 1, %s4646_s21  }
 0x98a   : > { %p13_p5 = scmp.ge.s32.totalorder %s16_s21, 4  }
 0x98c   :  { %15 = sbr.rel (!%p13_p5) target bundleno = 1 (0x1), region = 78 }

</bundles_post_ra>
